<compile_context>
chip_gen: v7x
topology: tpu7x:2x2x1
jax: 0.10.0
libtpu: 0.0.40
codegen_flags: <defaults>
</compile_context>

<pallas_src>
import jax
import jax.numpy as jnp
from jax.experimental import pallas as pl
from jax.experimental.pallas import tpu as pltpu


def gacd_kernel(lt_ref, mt_ref, x_ref,
                w1_ref, b1_ref, w2_ref, b2_ref,
                wm_ref, bm_ref,
                wq_ref, bq_ref,
                wkc_ref, bkc_ref,
                wkd_ref, bkd_ref,
                wv_ref, bv_ref,
                out_ref,
                lang_s, wc_s, wd_s, cc_s, cd_s, m_s, l_s, acc_s):
    phase = pl.program_id(1)   # 0: accumulate softmax stats / f_col, 1: write outputs
    nt = pl.program_id(2)      # N_v tile index
    dim = wq_ref.shape[1]
    scale = dim ** -0.5

    # ---- per-batch setup: LangProject, query, q-fold, accumulator init ----
    @pl.when(jnp.logical_and(phase == 0, nt == 0))
    def _setup():
        lt = lt_ref[0]                                      # (N_l, Lc)
        mt = mt_ref[0]                                      # (1, N_l)
        denom = jnp.sum(mt, axis=1, keepdims=True)          # (1, 1)  (mirrors PyTorch: no zero-length guard)
        pooled = jnp.dot(mt, lt, preferred_element_type=jnp.float32) / denom           # (1, Lc)
        h = jnp.maximum(
            jnp.dot(pooled, w1_ref[...], preferred_element_type=jnp.float32) + b1_ref[...], 0.0)
        lang = jnp.dot(h, w2_ref[...], preferred_element_type=jnp.float32) + b2_ref[...]  # (1, C)
        lang_s[...] = lang
        q = jnp.dot(lang, wq_ref[...], preferred_element_type=jnp.float32) + bq_ref[...]  # (1, D)
        # Fold q into the key projections (review item 1):
        #   score_c = (xm @ Wkc + bkc) . q  ==  xm @ (Wkc q^T) + (bkc . q)
        wc_s[...] = jnp.sum(wkc_ref[...] * q, axis=1, keepdims=True)   # (D, 1)
        wd_s[...] = jnp.sum(wkd_ref[...] * q, axis=1, keepdims=True)   # (D, 1)
        cc_s[...] = jnp.sum(bkc_ref[...] * q, axis=1, keepdims=True)   # (1, 1)
        cd_s[...] = jnp.sum(bkd_ref[...] * q, axis=1, keepdims=True)   # (1, 1)
        m_s[...] = jnp.full_like(m_s, -jnp.inf)
        l_s[...] = jnp.zeros_like(l_s)
        acc_s[...] = jnp.zeros_like(acc_s)

    # ---- shared per-tile compute: language-gated visual features (mm_gen) ----
    lang = lang_s[...]                                  # (1, C) f32
    x_t = x_ref[0].astype(jnp.float32)                  # (T, C)  (x stored bf16 in HBM)
    xs_b = (lang * x_t).astype(jnp.bfloat16)            # gate in f32, feed MXU in bf16
    xm = jnp.maximum(
        jnp.dot(xs_b, wm_ref[...], preferred_element_type=jnp.float32) + bm_ref[...], 0.0)  # (T, D) f32
    xm_b = xm.astype(jnp.bfloat16)
    xm_b32 = xm_b.astype(jnp.float32)

    # ---- phase 0: online-softmax accumulation of f_col over N_v tiles ----
    @pl.when(phase == 0)
    def _accumulate():
        v = jnp.dot(xm_b, wv_ref[...], preferred_element_type=jnp.float32) + bv_ref[...]     # (T, D)
        sc = (jnp.dot(xm_b32, wc_s[...], preferred_element_type=jnp.float32)
              + cc_s[...]) * scale                                                           # (T, 1)
        m_prev = m_s[...]
        m_new = jnp.maximum(m_prev, jnp.max(sc, axis=0, keepdims=True))                      # (1, 1)
        alpha = jnp.exp(m_prev - m_new)
        p = jnp.exp(sc - m_new)                                                              # (T, 1)
        l_s[...] = alpha * l_s[...] + jnp.sum(p, axis=0, keepdims=True)
        acc_s[...] = alpha * acc_s[...] + jnp.sum(p * v, axis=0, keepdims=True)              # (1, D)
        m_s[...] = m_new

    # ---- phase 1: per-tile output  xm + sigmoid(score_d) * f_col ----
    @pl.when(phase == 1)
    def _finalize():
        f_col = acc_s[...] / l_s[...]                                                        # (1, D)
        sd = (jnp.dot(xm_b32, wd_s[...], preferred_element_type=jnp.float32)
              + cd_s[...]) * scale                                                           # (T, 1)
        out_ref[0] = (xm + jax.nn.sigmoid(sd) * f_col).astype(out_ref.dtype)


def _pick_tile(n, target):
    for cand in (target, 512, 256, 128, 64, 32, 16, 8):
        if cand <= n and n % cand == 0:
            return cand
    return n


def gacd_forward(x, l, l_mask, params, *, tile_nv=128):
    (w1, b1, w2, b2, wm, bm, wq, bq, wkc, bkc, wkd, bkd, wv, bv) = params
    B, Nv, C = x.shape
    _, Lc, Nl = l.shape
    D = wq.shape[1]

    tile = _pick_tile(Nv, tile_nv)
    n_tiles = Nv // tile

    # channel-last language tokens / mask; bf16 for the Nv-scale operand and MXU weights
    lt = jnp.transpose(l, (0, 2, 1)).astype(jnp.float32)        # (B, N_l, Lc)
    mt = jnp.transpose(l_mask, (0, 2, 1)).astype(jnp.float32)   # (B, 1, N_l)
    x_b = x.astype(jnp.bfloat16)
    wm_b = wm.astype(jnp.bfloat16)
    wv_b = wv.astype(jnp.bfloat16)

    weights = [w1, b1, w2, b2, wm_b, bm, wq, bq, wkc, bkc, wkd, bkd, wv_b, bv]

    in_specs = [
        pl.BlockSpec((1, Nl, Lc), lambda b, p, t: (b, 0, 0)),
        pl.BlockSpec((1, 1, Nl), lambda b, p, t: (b, 0, 0)),
        pl.BlockSpec((1, tile, C), lambda b, p, t: (b, t, 0)),
    ] + [pl.BlockSpec(w.shape, lambda b, p, t: (0, 0)) for w in weights]

    # Output only written in phase 1; keep its block index pinned at 0 during phase 0
    # so no partially-written block is ever flushed.
    out_spec = pl.BlockSpec((1, tile, D), lambda b, p, t: (b, t * p, 0))

    scratch = [
        pltpu.VMEM((1, C), jnp.float32),    # lang vector
        pltpu.VMEM((D, 1), jnp.float32),    # Wkc @ q^T
        pltpu.VMEM((D, 1), jnp.float32),    # Wkd @ q^T
        pltpu.VMEM((1, 1), jnp.float32),    # bkc . q
        pltpu.VMEM((1, 1), jnp.float32),    # bkd . q
        pltpu.VMEM((1, 1), jnp.float32),    # running softmax max
        pltpu.VMEM((1, 1), jnp.float32),    # running softmax denom
        pltpu.VMEM((1, D), jnp.float32),    # running weighted sum of V
    ]

    return pl.pallas_call(
        gacd_kernel,
        out_shape=jax.ShapeDtypeStruct((B, Nv, D), jnp.float32),
        grid_spec=pltpu.PrefetchScalarGridSpec(
            num_scalar_prefetch=0,
            grid=(B, 2, n_tiles),
            in_specs=in_specs,
            out_specs=out_spec,
            scratch_shapes=scratch,
        ),
        compiler_params=pltpu.CompilerParams(
            dimension_semantics=("parallel", "arbitrary", "arbitrary"),
            vmem_limit_bytes=64 * 1024 * 1024,   # explicit budget; tiled design stays far below it
        ),
    )(lt, mt, x_b, *weights)


def gacd_reference(x, l, l_mask, params):
    """Pure-JAX reference mirroring the PyTorch forward structure exactly.

    It mirrors the kernel's intentional bf16 quantization points (x, wm, wv and the
    xs/xm activations fed to the MXU) so the comparison isolates structural errors.
    """
    (w1, b1, w2, b2, wm, bm, wq, bq, wkc, bkc, wkd, bkd, wv, bv) = params
    D = wq.shape[1]
    f32 = jnp.float32
    x32 = x.astype(jnp.bfloat16).astype(f32)
    wm32 = wm.astype(jnp.bfloat16).astype(f32)
    wv32 = wv.astype(jnp.bfloat16).astype(f32)

    m = jnp.transpose(l_mask, (0, 2, 1))                       # (B, 1, N_l)
    lang = jnp.sum(l * m, axis=-1) / jnp.sum(m, axis=-1)       # (B, Lc)
    h = jax.nn.relu(lang @ w1 + b1[0])
    lang = (h @ w2 + b2[0])[:, None, :]                        # (B, 1, C)
    xs = (lang * x32).astype(jnp.bfloat16).astype(f32)
    xm = jax.nn.relu(xs @ wm32 + bm[0])                        # (B, N_v, D)
    xm_b = xm.astype(jnp.bfloat16).astype(f32)
    q = lang @ wq + bq[0]                                      # (B, 1, D)
    kc = xm_b @ wkc + bkc[0]
    kd = xm_b @ wkd + bkd[0]
    v = xm_b @ wv32 + bv[0]
    scale = D ** -0.5
    a_c = jax.nn.softmax(jnp.einsum('bqd,bkd->bqk', q, kc) * scale, axis=-1)
    a_d = jax.nn.sigmoid(jnp.einsum('bqd,bkd->bqk', q, kd) * scale)
    f_col = jnp.einsum('bqk,bkd->bqd', a_c, v)
    f_dif = jnp.einsum('bqk,bqd->bkd', a_d, f_col)
    return xm + f_dif


def _init_linear(key, n_in, n_out):
    kw, kb = jax.random.split(key)
    w = jax.random.normal(kw, (n_in, n_out), jnp.float32) * (1.0 / (n_in ** 0.5))
    b = jax.random.normal(kb, (1, n_out), jnp.float32) * 0.01
    return w, b


if __name__ == "__main__":
    # batch, spatial 16x16 -> 256 visual tokens, v_in_channels(=dim)=32, l_in=16, words=8
    B, Hs, Ws, C, Lc, Nl = 2, 16, 16, 32, 16, 8
    Nv = Hs * Ws
    D = C                                  # module requires dim == v_in_channels

    root = jax.random.PRNGKey(0)
    k_x, k_l, k1, k2, k3, k4, k5, k6, k7 = jax.random.split(root, 9)

    x = jax.random.normal(k_x, (B, Nv, C), jnp.float32)
    l = jax.random.normal(k_l, (B, Lc, Nl), jnp.float32)
    lengths = jnp.array([5, 7], dtype=jnp.int32)
    l_mask = (jnp.arange(Nl)[None, :] < lengths[:, None]).astype(jnp.float32)[..., None]  # (B, Nl, 1)

    w1, b1 = _init_linear(k1, Lc, C)       # LangProject linear 1
    w2, b2 = _init_linear(k2, C, C)        # LangProject linear 2
    wm, bm = _init_linear(k3, C, D)        # mm_gen
    wq, bq = _init_linear(k4, D, D)        # query
    wkc, bkc = _init_linear(k5, D, D)      # key_c
    wkd, bkd = _init_linear(k6, D, D)      # key_d
    wv, bv = _init_linear(k7, D, D)        # value
    params = (w1, b1, w2, b2, wm, bm, wq, bq, wkc, bkc, wkd, bkd, wv, bv)

    out = gacd_forward(x, l, l_mask, params)
    out = jax.block_until_ready(out)

    ref = gacd_reference(x, l, l_mask, params)
    assert out.shape == (B, Nv, D)
    max_err = float(jnp.max(jnp.abs(out - ref)))
    assert jnp.allclose(out, ref, atol=1e-2, rtol=1e-2), f"mismatch vs reference (max abs err {max_err})"

    print("KERNEL_OK")
</pallas_src>

<mosaic_0001>
module attributes {stable_mosaic.version = 11 : i64} {
  func.func @gacd_kernel(%arg0: i32, %arg1: i32, %arg2: i32, %arg3: memref<1x8x16xf32, #tpu.memory_space<vmem>>, %arg4: memref<1x1x8xf32, #tpu.memory_space<vmem>>, %arg5: memref<1x128x32xbf16, #tpu.memory_space<vmem>>, %arg6: memref<16x32xf32, #tpu.memory_space<vmem>>, %arg7: memref<1x32xf32, #tpu.memory_space<vmem>>, %arg8: memref<32x32xf32, #tpu.memory_space<vmem>>, %arg9: memref<1x32xf32, #tpu.memory_space<vmem>>, %arg10: memref<32x32xbf16, #tpu.memory_space<vmem>>, %arg11: memref<1x32xf32, #tpu.memory_space<vmem>>, %arg12: memref<32x32xf32, #tpu.memory_space<vmem>>, %arg13: memref<1x32xf32, #tpu.memory_space<vmem>>, %arg14: memref<32x32xf32, #tpu.memory_space<vmem>>, %arg15: memref<1x32xf32, #tpu.memory_space<vmem>>, %arg16: memref<32x32xf32, #tpu.memory_space<vmem>>, %arg17: memref<1x32xf32, #tpu.memory_space<vmem>>, %arg18: memref<32x32xbf16, #tpu.memory_space<vmem>>, %arg19: memref<1x32xf32, #tpu.memory_space<vmem>>, %arg20: memref<1x128x32xf32, #tpu.memory_space<vmem>>, %arg21: memref<1x32xf32, #tpu.memory_space<vmem>>, %arg22: memref<32x1xf32, #tpu.memory_space<vmem>>, %arg23: memref<32x1xf32, #tpu.memory_space<vmem>>, %arg24: memref<1x1xf32, #tpu.memory_space<vmem>>, %arg25: memref<1x1xf32, #tpu.memory_space<vmem>>, %arg26: memref<1x1xf32, #tpu.memory_space<vmem>>, %arg27: memref<1x1xf32, #tpu.memory_space<vmem>>, %arg28: memref<1x32xf32, #tpu.memory_space<vmem>>) attributes {dimension_semantics = [#tpu.dimension_semantics<parallel>, #tpu.dimension_semantics<arbitrary>, #tpu.dimension_semantics<arbitrary>], iteration_bounds = array<i64: 2, 2, 2>, scalar_prefetch = 0 : i64, scratch_operands = 8 : i64, tpu.core_type = #tpu.core_type<tc>, window_params = [{transform_indices = @transform_0, window_bounds = array<i64: 1, 8, 16>}, {transform_indices = @transform_1, window_bounds = array<i64: 1, 1, 8>}, {transform_indices = @transform_2, window_bounds = array<i64: 1, 128, 32>}, {pipeline_mode = #tpu.pipeline_mode<synchronous>, transform_indices = @transform_3, window_bounds = array<i64: 16, 32>}, {pipeline_mode = #tpu.pipeline_mode<synchronous>, transform_indices = @transform_4, window_bounds = array<i64: 1, 32>}, {pipeline_mode = #tpu.pipeline_mode<synchronous>, transform_indices = @transform_5, window_bounds = array<i64: 32, 32>}, {pipeline_mode = #tpu.pipeline_mode<synchronous>, transform_indices = @transform_6, window_bounds = array<i64: 1, 32>}, {pipeline_mode = #tpu.pipeline_mode<synchronous>, transform_indices = @transform_7, window_bounds = array<i64: 32, 32>}, {pipeline_mode = #tpu.pipeline_mode<synchronous>, transform_indices = @transform_8, window_bounds = array<i64: 1, 32>}, {pipeline_mode = #tpu.pipeline_mode<synchronous>, transform_indices = @transform_9, window_bounds = array<i64: 32, 32>}, {pipeline_mode = #tpu.pipeline_mode<synchronous>, transform_indices = @transform_10, window_bounds = array<i64: 1, 32>}, {pipeline_mode = #tpu.pipeline_mode<synchronous>, transform_indices = @transform_11, window_bounds = array<i64: 32, 32>}, {pipeline_mode = #tpu.pipeline_mode<synchronous>, transform_indices = @transform_12, window_bounds = array<i64: 1, 32>}, {pipeline_mode = #tpu.pipeline_mode<synchronous>, transform_indices = @transform_13, window_bounds = array<i64: 32, 32>}, {pipeline_mode = #tpu.pipeline_mode<synchronous>, transform_indices = @transform_14, window_bounds = array<i64: 1, 32>}, {pipeline_mode = #tpu.pipeline_mode<synchronous>, transform_indices = @transform_15, window_bounds = array<i64: 32, 32>}, {pipeline_mode = #tpu.pipeline_mode<synchronous>, transform_indices = @transform_16, window_bounds = array<i64: 1, 32>}, {transform_indices = @transform_17, window_bounds = array<i64: 1, 128, 32>}]} {
    %c0_i32 = arith.constant 0 : i32
    %0 = arith.cmpi eq, %arg1, %c0_i32 : i32
    %c0_i32_0 = arith.constant 0 : i32
    %1 = arith.cmpi eq, %arg2, %c0_i32_0 : i32
    %2 = arith.andi %0, %1 : i1
    %3 = arith.extui %2 : i1 to i32
    %c0_i32_1 = arith.constant 0 : i32
    %4 = arith.cmpi ne, %3, %c0_i32_1 : i32
    scf.if %4 {
      %c0_14 = arith.constant 0 : index
      %c0_15 = arith.constant 0 : index
      %c0_16 = arith.constant 0 : index
      %27 = vector.load %arg3[%c0_14, %c0_15, %c0_16] : memref<1x8x16xf32, #tpu.memory_space<vmem>>, vector<1x8x16xf32>
      %28 = vector.shape_cast %27 : vector<1x8x16xf32> to vector<8x16xf32>
      %c0_17 = arith.constant 0 : index
      %c0_18 = arith.constant 0 : index
      %c0_19 = arith.constant 0 : index
      %29 = vector.load %arg4[%c0_17, %c0_18, %c0_19] : memref<1x1x8xf32, #tpu.memory_space<vmem>>, vector<1x1x8xf32>
      %30 = vector.shape_cast %29 : vector<1x1x8xf32> to vector<1x8xf32>
      %cst_20 = arith.constant dense<0.000000e+00> : vector<1xf32>
      %31 = vector.multi_reduction <add>, %30, %cst_20 [1] : vector<1x8xf32> to vector<1xf32>
      %32 = vector.shape_cast %31 : vector<1xf32> to vector<1x1xf32>
      %cst_21 = arith.constant dense<0.000000e+00> : vector<1x16xf32>
      %33 = tpu.matmul %30, %28, %cst_21 {dimension_numbers = #tpu.dot_dimension_numbers<[1], [0], [0], [1], [0, 0, 1, 1], [], []>} : vector<1x8xf32>, vector<8x16xf32>, vector<1x16xf32> -> vector<1x16xf32>
      %34 = vector.broadcast %32 : vector<1x1xf32> to vector<1x16xf32>
      %35 = arith.divf %33, %34 : vector<1x16xf32>
      %c0_22 = arith.constant 0 : index
      %c0_23 = arith.constant 0 : index
      %36 = vector.load %arg6[%c0_22, %c0_23] : memref<16x32xf32, #tpu.memory_space<vmem>>, vector<16x32xf32>
      %cst_24 = arith.constant dense<0.000000e+00> : vector<1x32xf32>
      %37 = tpu.matmul %35, %36, %cst_24 {dimension_numbers = #tpu.dot_dimension_numbers<[1], [0], [0], [1], [0, 0, 1, 1], [], []>} : vector<1x16xf32>, vector<16x32xf32>, vector<1x32xf32> -> vector<1x32xf32>
      %c0_25 = arith.constant 0 : index
      %c0_26 = arith.constant 0 : index
      %38 = vector.load %arg7[%c0_25, %c0_26] : memref<1x32xf32, #tpu.memory_space<vmem>>, vector<1x32xf32>
      %39 = arith.addf %37, %38 : vector<1x32xf32>
      %cst_27 = arith.constant 0.000000e+00 : f32
      %40 = vector.broadcast %cst_27 : f32 to vector<1x32xf32>
      %41 = arith.maximumf %39, %40 : vector<1x32xf32>
      %c0_28 = arith.constant 0 : index
      %c0_29 = arith.constant 0 : index
      %42 = vector.load %arg8[%c0_28, %c0_29] : memref<32x32xf32, #tpu.memory_space<vmem>>, vector<32x32xf32>
      %cst_30 = arith.constant dense<0.000000e+00> : vector<1x32xf32>
      %43 = tpu.matmul %41, %42, %cst_30 {dimension_numbers = #tpu.dot_dimension_numbers<[1], [0], [0], [1], [0, 0, 1, 1], [], []>} : vector<1x32xf32>, vector<32x32xf32>, vector<1x32xf32> -> vector<1x32xf32>
      %c0_31 = arith.constant 0 : index
      %c0_32 = arith.constant 0 : index
      %44 = vector.load %arg9[%c0_31, %c0_32] : memref<1x32xf32, #tpu.memory_space<vmem>>, vector<1x32xf32>
      %45 = arith.addf %43, %44 : vector<1x32xf32>
      %c0_33 = arith.constant 0 : index
      %c0_34 = arith.constant 0 : index
      %46 = vector.load %arg21[%c0_33, %c0_34] : memref<1x32xf32, #tpu.memory_space<vmem>>, vector<1x32xf32>
      tpu.vector_store %arg21[%c0_33, %c0_34], %45 {strides = array<i32>} : memref<1x32xf32, #tpu.memory_space<vmem>>, vector<1x32xf32>,
      %c0_35 = arith.constant 0 : index
      %c0_36 = arith.constant 0 : index
      %47 = vector.load %arg12[%c0_35, %c0_36] : memref<32x32xf32, #tpu.memory_space<vmem>>, vector<32x32xf32>
      %cst_37 = arith.constant dense<0.000000e+00> : vector<1x32xf32>
      %48 = tpu.matmul %45, %47, %cst_37 {dimension_numbers = #tpu.dot_dimension_numbers<[1], [0], [0], [1], [0, 0, 1, 1], [], []>} : vector<1x32xf32>, vector<32x32xf32>, vector<1x32xf32> -> vector<1x32xf32>
      %c0_38 = arith.constant 0 : index
      %c0_39 = arith.constant 0 : index
      %49 = vector.load %arg13[%c0_38, %c0_39] : memref<1x32xf32, #tpu.memory_space<vmem>>, vector<1x32xf32>
      %50 = arith.addf %48, %49 : vector<1x32xf32>
      %c0_40 = arith.constant 0 : index
      %c0_41 = arith.constant 0 : index
      %51 = vector.load %arg14[%c0_40, %c0_41] : memref<32x32xf32, #tpu.memory_space<vmem>>, vector<32x32xf32>
      %52 = vector.broadcast %50 : vector<1x32xf32> to vector<32x32xf32>
      %53 = arith.mulf %51, %52 : vector<32x32xf32>
      %cst_42 = arith.constant dense<0.000000e+00> : vector<32xf32>
      %54 = vector.multi_reduction <add>, %53, %cst_42 [1] : vector<32x32xf32> to vector<32xf32>
      %55 = vector.shape_cast %54 : vector<32xf32> to vector<32x1xf32>
      %c0_43 = arith.constant 0 : index
      %c0_44 = arith.constant 0 : index
      %56 = vector.load %arg22[%c0_43, %c0_44] : memref<32x1xf32, #tpu.memory_space<vmem>>, vector<32x1xf32>
      tpu.vector_store %arg22[%c0_43, %c0_44], %55 {strides = array<i32>} : memref<32x1xf32, #tpu.memory_space<vmem>>, vector<32x1xf32>,
      %c0_45 = arith.constant 0 : index
      %c0_46 = arith.constant 0 : index
      %57 = vector.load %arg16[%c0_45, %c0_46] : memref<32x32xf32, #tpu.memory_space<vmem>>, vector<32x32xf32>
      %58 = vector.broadcast %50 : vector<1x32xf32> to vector<32x32xf32>
      %59 = arith.mulf %57, %58 : vector<32x32xf32>
      %cst_47 = arith.constant dense<0.000000e+00> : vector<32xf32>
      %60 = vector.multi_reduction <add>, %59, %cst_47 [1] : vector<32x32xf32> to vector<32xf32>
      %61 = vector.shape_cast %60 : vector<32xf32> to vector<32x1xf32>
      %c0_48 = arith.constant 0 : index
      %c0_49 = arith.constant 0 : index
      %62 = vector.load %arg23[%c0_48, %c0_49] : memref<32x1xf32, #tpu.memory_space<vmem>>, vector<32x1xf32>
      tpu.vector_store %arg23[%c0_48, %c0_49], %61 {strides = array<i32>} : memref<32x1xf32, #tpu.memory_space<vmem>>, vector<32x1xf32>,
      %c0_50 = arith.constant 0 : index
      %c0_51 = arith.constant 0 : index
      %63 = vector.load %arg15[%c0_50, %c0_51] : memref<1x32xf32, #tpu.memory_space<vmem>>, vector<1x32xf32>
      %64 = arith.mulf %63, %50 : vector<1x32xf32>
      %cst_52 = arith.constant dense<0.000000e+00> : vector<1xf32>
      %65 = vector.multi_reduction <add>, %64, %cst_52 [1] : vector<1x32xf32> to vector<1xf32>
      %66 = vector.shape_cast %65 : vector<1xf32> to vector<1x1xf32>
      %c0_53 = arith.constant 0 : index
      %c0_54 = arith.constant 0 : index
      %67 = vector.load %arg24[%c0_53, %c0_54] : memref<1x1xf32, #tpu.memory_space<vmem>>, vector<1x1xf32>
      tpu.vector_store %arg24[%c0_53, %c0_54], %66 {strides = array<i32>} : memref<1x1xf32, #tpu.memory_space<vmem>>, vector<1x1xf32>,
      %c0_55 = arith.constant 0 : index
      %c0_56 = arith.constant 0 : index
      %68 = vector.load %arg17[%c0_55, %c0_56] : memref<1x32xf32, #tpu.memory_space<vmem>>, vector<1x32xf32>
      %69 = arith.mulf %68, %50 : vector<1x32xf32>
      %cst_57 = arith.constant dense<0.000000e+00> : vector<1xf32>
      %70 = vector.multi_reduction <add>, %69, %cst_57 [1] : vector<1x32xf32> to vector<1xf32>
      %71 = vector.shape_cast %70 : vector<1xf32> to vector<1x1xf32>
      %c0_58 = arith.constant 0 : index
      %c0_59 = arith.constant 0 : index
      %72 = vector.load %arg25[%c0_58, %c0_59] : memref<1x1xf32, #tpu.memory_space<vmem>>, vector<1x1xf32>
      tpu.vector_store %arg25[%c0_58, %c0_59], %71 {strides = array<i32>} : memref<1x1xf32, #tpu.memory_space<vmem>>, vector<1x1xf32>,
      %cst_60 = arith.constant 0xFF800000 : f32
      %73 = vector.broadcast %cst_60 : f32 to vector<1x1xf32>
      %c0_61 = arith.constant 0 : index
      %c0_62 = arith.constant 0 : index
      %74 = vector.load %arg26[%c0_61, %c0_62] : memref<1x1xf32, #tpu.memory_space<vmem>>, vector<1x1xf32>
      tpu.vector_store %arg26[%c0_61, %c0_62], %73 {strides = array<i32>} : memref<1x1xf32, #tpu.memory_space<vmem>>, vector<1x1xf32>,
      %cst_63 = arith.constant 0.000000e+00 : f32
      %75 = vector.broadcast %cst_63 : f32 to vector<1x1xf32>
      %c0_64 = arith.constant 0 : index
      %c0_65 = arith.constant 0 : index
      %76 = vector.load %arg27[%c0_64, %c0_65] : memref<1x1xf32, #tpu.memory_space<vmem>>, vector<1x1xf32>
      tpu.vector_store %arg27[%c0_64, %c0_65], %75 {strides = array<i32>} : memref<1x1xf32, #tpu.memory_space<vmem>>, vector<1x1xf32>,
      %cst_66 = arith.constant 0.000000e+00 : f32
      %77 = vector.broadcast %cst_66 : f32 to vector<1x32xf32>
      %c0_67 = arith.constant 0 : index
      %c0_68 = arith.constant 0 : index
      %78 = vector.load %arg28[%c0_67, %c0_68] : memref<1x32xf32, #tpu.memory_space<vmem>>, vector<1x32xf32>
      tpu.vector_store %arg28[%c0_67, %c0_68], %77 {strides = array<i32>} : memref<1x32xf32, #tpu.memory_space<vmem>>, vector<1x32xf32>,
    } else {
    }
    %c0 = arith.constant 0 : index
    %c0_2 = arith.constant 0 : index
    %5 = vector.load %arg21[%c0, %c0_2] : memref<1x32xf32, #tpu.memory_space<vmem>>, vector<1x32xf32>
    %c0_3 = arith.constant 0 : index
    %c0_4 = arith.constant 0 : index
    %c0_5 = arith.constant 0 : index
    %6 = vector.load %arg5[%c0_3, %c0_4, %c0_5] : memref<1x128x32xbf16, #tpu.memory_space<vmem>>, vector<1x128x32xbf16>
    %7 = vector.shape_cast %6 : vector<1x128x32xbf16> to vector<128x32xbf16>
    %8 = arith.extf %7 : vector<128x32xbf16> to vector<128x32xf32>
    %9 = vector.broadcast %5 : vector<1x32xf32> to vector<128x32xf32>
    %10 = arith.mulf %9, %8 : vector<128x32xf32>
    %11 = arith.truncf %10 : vector<128x32xf32> to vector<128x32xbf16>
    %c0_6 = arith.constant 0 : index
    %c0_7 = arith.constant 0 : index
    %12 = vector.load %arg10[%c0_6, %c0_7] : memref<32x32xbf16, #tpu.memory_space<vmem>>, vector<32x32xbf16>
    %cst = arith.constant dense<0.000000e+00> : vector<128x32xf32>
    %13 = tpu.matmul %11, %12, %cst {dimension_numbers = #tpu.dot_dimension_numbers<[1], [0], [0], [1], [0, 0, 1, 1], [], []>} : vector<128x32xbf16>, vector<32x32xbf16>, vector<128x32xf32> -> vector<128x32xf32>
    %c0_8 = arith.constant 0 : index
    %c0_9 = arith.constant 0 : index
    %14 = vector.load %arg11[%c0_8, %c0_9] : memref<1x32xf32, #tpu.memory_space<vmem>>, vector<1x32xf32>
    %15 = vector.broadcast %14 : vector<1x32xf32> to vector<128x32xf32>
    %16 = arith.addf %13, %15 : vector<128x32xf32>
    %cst_10 = arith.constant 0.000000e+00 : f32
    %17 = vector.broadcast %cst_10 : f32 to vector<128x32xf32>
    %18 = arith.maximumf %16, %17 : vector<128x32xf32>
    %19 = arith.truncf %18 : vector<128x32xf32> to vector<128x32xbf16>
    %20 = arith.extf %19 : vector<128x32xbf16> to vector<128x32xf32>
    %c0_i32_11 = arith.constant 0 : i32
    %21 = arith.cmpi eq, %arg1, %c0_i32_11 : i32
    %22 = arith.extui %21 : i1 to i32
    %c0_i32_12 = arith.constant 0 : i32
    %23 = arith.cmpi ne, %22, %c0_i32_12 : i32
    scf.if %23 {
      %c0_14 = arith.constant 0 : index
      %c0_15 = arith.constant 0 : index
      %27 = vector.load %arg18[%c0_14, %c0_15] : memref<32x32xbf16, #tpu.memory_space<vmem>>, vector<32x32xbf16>
      %cst_16 = arith.constant dense<0.000000e+00> : vector<128x32xf32>
      %28 = tpu.matmul %19, %27, %cst_16 {dimension_numbers = #tpu.dot_dimension_numbers<[1], [0], [0], [1], [0, 0, 1, 1], [], []>} : vector<128x32xbf16>, vector<32x32xbf16>, vector<128x32xf32> -> vector<128x32xf32>
      %c0_17 = arith.constant 0 : index
      %c0_18 = arith.constant 0 : index
      %29 = vector.load %arg19[%c0_17, %c0_18] : memref<1x32xf32, #tpu.memory_space<vmem>>, vector<1x32xf32>
      %30 = vector.broadcast %29 : vector<1x32xf32> to vector<128x32xf32>
      %31 = arith.addf %28, %30 : vector<128x32xf32>
      %c0_19 = arith.constant 0 : index
      %c0_20 = arith.constant 0 : index
      %32 = vector.load %arg22[%c0_19, %c0_20] : memref<32x1xf32, #tpu.memory_space<vmem>>, vector<32x1xf32>
      %cst_21 = arith.constant dense<0.000000e+00> : vector<128x1xf32>
      %33 = tpu.matmul %20, %32, %cst_21 {dimension_numbers = #tpu.dot_dimension_numbers<[1], [0], [0], [1], [0, 0, 1, 1], [], []>} : vector<128x32xf32>, vector<32x1xf32>, vector<128x1xf32> -> vector<128x1xf32>
      %c0_22 = arith.constant 0 : index
      %c0_23 = arith.constant 0 : index
      %34 = vector.load %arg24[%c0_22, %c0_23] : memref<1x1xf32, #tpu.memory_space<vmem>>, vector<1x1xf32>
      %35 = vector.broadcast %34 : vector<1x1xf32> to vector<128x1xf32>
      %36 = arith.addf %33, %35 : vector<128x1xf32>
      %cst_24 = arith.constant 0.176776692 : f32
      %37 = vector.broadcast %cst_24 : f32 to vector<128x1xf32>
      %38 = arith.mulf %36, %37 : vector<128x1xf32>
      %c0_25 = arith.constant 0 : index
      %c0_26 = arith.constant 0 : index
      %39 = vector.load %arg26[%c0_25, %c0_26] : memref<1x1xf32, #tpu.memory_space<vmem>>, vector<1x1xf32>
      %cst_27 = arith.constant dense<0xFF800000> : vector<1xf32>
      %40 = vector.multi_reduction <maximumf>, %38, %cst_27 [0] : vector<128x1xf32> to vector<1xf32>
      %41 = vector.shape_cast %40 : vector<1xf32> to vector<1x1xf32>
      %42 = arith.maximumf %39, %41 : vector<1x1xf32>
      %43 = arith.subf %39, %42 : vector<1x1xf32>
      %44 = math.exp %43 : vector<1x1xf32>
      %45 = vector.broadcast %42 : vector<1x1xf32> to vector<128x1xf32>
      %46 = arith.subf %38, %45 : vector<128x1xf32>
      %47 = math.exp %46 : vector<128x1xf32>
      %c0_28 = arith.constant 0 : index
      %c0_29 = arith.constant 0 : index
      %48 = vector.load %arg27[%c0_28, %c0_29] : memref<1x1xf32, #tpu.memory_space<vmem>>, vector<1x1xf32>
      %49 = arith.mulf %44, %48 : vector<1x1xf32>
      %cst_30 = arith.constant dense<0.000000e+00> : vector<1xf32>
      %50 = vector.multi_reduction <add>, %47, %cst_30 [0] : vector<128x1xf32> to vector<1xf32>
      %51 = vector.shape_cast %50 : vector<1xf32> to vector<1x1xf32>
      %52 = arith.addf %49, %51 : vector<1x1xf32>
      %c0_31 = arith.constant 0 : index
      %c0_32 = arith.constant 0 : index
      %53 = vector.load %arg27[%c0_31, %c0_32] : memref<1x1xf32, #tpu.memory_space<vmem>>, vector<1x1xf32>
      tpu.vector_store %arg27[%c0_31, %c0_32], %52 {strides = array<i32>} : memref<1x1xf32, #tpu.memory_space<vmem>>, vector<1x1xf32>,
      %c0_33 = arith.constant 0 : index
      %c0_34 = arith.constant 0 : index
      %54 = vector.load %arg28[%c0_33, %c0_34] : memref<1x32xf32, #tpu.memory_space<vmem>>, vector<1x32xf32>
      %55 = vector.broadcast %44 : vector<1x1xf32> to vector<1x32xf32>
      %56 = arith.mulf %55, %54 : vector<1x32xf32>
      %57 = vector.broadcast %47 : vector<128x1xf32> to vector<128x32xf32>
      %58 = arith.mulf %57, %31 : vector<128x32xf32>
      %cst_35 = arith.constant dense<0.000000e+00> : vector<32xf32>
      %59 = vector.multi_reduction <add>, %58, %cst_35 [0] : vector<128x32xf32> to vector<32xf32>
      %60 = vector.shape_cast %59 : vector<32xf32> to vector<1x32xf32>
      %61 = arith.addf %56, %60 : vector<1x32xf32>
      %c0_36 = arith.constant 0 : index
      %c0_37 = arith.constant 0 : index
      %62 = vector.load %arg28[%c0_36, %c0_37] : memref<1x32xf32, #tpu.memory_space<vmem>>, vector<1x32xf32>
      tpu.vector_store %arg28[%c0_36, %c0_37], %61 {strides = array<i32>} : memref<1x32xf32, #tpu.memory_space<vmem>>, vector<1x32xf32>,
      %c0_38 = arith.constant 0 : index
      %c0_39 = arith.constant 0 : index
      %63 = vector.load %arg26[%c0_38, %c0_39] : memref<1x1xf32, #tpu.memory_space<vmem>>, vector<1x1xf32>
      tpu.vector_store %arg26[%c0_38, %c0_39], %42 {strides = array<i32>} : memref<1x1xf32, #tpu.memory_space<vmem>>, vector<1x1xf32>,
    } else {
    }
    %c1_i32 = arith.constant 1 : i32
    %24 = arith.cmpi eq, %arg1, %c1_i32 : i32
    %25 = arith.extui %24 : i1 to i32
    %c0_i32_13 = arith.constant 0 : i32
    %26 = arith.cmpi ne, %25, %c0_i32_13 : i32
    scf.if %26 {
      %c0_14 = arith.constant 0 : index
      %c0_15 = arith.constant 0 : index
      %27 = vector.load %arg28[%c0_14, %c0_15] : memref<1x32xf32, #tpu.memory_space<vmem>>, vector<1x32xf32>
      %c0_16 = arith.constant 0 : index
      %c0_17 = arith.constant 0 : index
      %28 = vector.load %arg27[%c0_16, %c0_17] : memref<1x1xf32, #tpu.memory_space<vmem>>, vector<1x1xf32>
      %29 = vector.broadcast %28 : vector<1x1xf32> to vector<1x32xf32>
      %30 = arith.divf %27, %29 : vector<1x32xf32>
      %c0_18 = arith.constant 0 : index
      %c0_19 = arith.constant 0 : index
      %31 = vector.load %arg23[%c0_18, %c0_19] : memref<32x1xf32, #tpu.memory_space<vmem>>, vector<32x1xf32>
      %cst_20 = arith.constant dense<0.000000e+00> : vector<128x1xf32>
      %32 = tpu.matmul %20, %31, %cst_20 {dimension_numbers = #tpu.dot_dimension_numbers<[1], [0], [0], [1], [0, 0, 1, 1], [], []>} : vector<128x32xf32>, vector<32x1xf32>, vector<128x1xf32> -> vector<128x1xf32>
      %c0_21 = arith.constant 0 : index
      %c0_22 = arith.constant 0 : index
      %33 = vector.load %arg25[%c0_21, %c0_22] : memref<1x1xf32, #tpu.memory_space<vmem>>, vector<1x1xf32>
      %34 = vector.broadcast %33 : vector<1x1xf32> to vector<128x1xf32>
      %35 = arith.addf %32, %34 : vector<128x1xf32>
      %cst_23 = arith.constant 0.176776692 : f32
      %36 = vector.broadcast %cst_23 : f32 to vector<128x1xf32>
      %37 = arith.mulf %35, %36 : vector<128x1xf32>
      %38 = arith.negf %37 : vector<128x1xf32>
      %39 = math.exp %38 : vector<128x1xf32>
      %cst_24 = arith.constant 1.000000e+00 : f32
      %40 = vector.broadcast %cst_24 : f32 to vector<128x1xf32>
      %41 = arith.addf %40, %39 : vector<128x1xf32>
      %42 = arith.divf %40, %41 : vector<128x1xf32>
      %43 = vector.broadcast %42 : vector<128x1xf32> to vector<128x32xf32>
      %44 = vector.broadcast %30 : vector<1x32xf32> to vector<128x32xf32>
      %45 = arith.mulf %43, %44 : vector<128x32xf32>
      %46 = arith.addf %18, %45 : vector<128x32xf32>
      %c0_25 = arith.constant 0 : index
      %c0_26 = arith.constant 0 : index
      %c0_27 = arith.constant 0 : index
      %47 = vector.load %arg20[%c0_25, %c0_26, %c0_27] : memref<1x128x32xf32, #tpu.memory_space<vmem>>, vector<1x128x32xf32>
      %48 = vector.shape_cast %47 : vector<1x128x32xf32> to vector<128x32xf32>
      %49 = vector.shape_cast %46 : vector<128x32xf32> to vector<1x128x32xf32>
      tpu.vector_store %arg20[%c0_25, %c0_26, %c0_27], %49 {strides = array<i32>} : memref<1x128x32xf32, #tpu.memory_space<vmem>>, vector<1x128x32xf32>,
    } else {
    }
    return
  }
  func.func @transform_0(%arg0: i32, %arg1: i32, %arg2: i32) -> (i32, i32, i32) {
    %c0_i32 = arith.constant 0 : i32
    %c0_i32_0 = arith.constant 0 : i32
    %c0_i32_1 = arith.constant 0 : i32
    return %arg0, %c0_i32, %c0_i32_0 : i32, i32, i32
  }
  func.func @transform_1(%arg0: i32, %arg1: i32, %arg2: i32) -> (i32, i32, i32) {
    %c0_i32 = arith.constant 0 : i32
    %c0_i32_0 = arith.constant 0 : i32
    %c0_i32_1 = arith.constant 0 : i32
    return %arg0, %c0_i32, %c0_i32_0 : i32, i32, i32
  }
  func.func @transform_2(%arg0: i32, %arg1: i32, %arg2: i32) -> (i32, i32, i32) {
    %c0_i32 = arith.constant 0 : i32
    %c0_i32_0 = arith.constant 0 : i32
    return %arg0, %arg2, %c0_i32 : i32, i32, i32
  }
  func.func @transform_3(%arg0: i32, %arg1: i32, %arg2: i32) -> (i32, i32) {
    %c0_i32 = arith.constant 0 : i32
    %c0_i32_0 = arith.constant 0 : i32
    %c0_i32_1 = arith.constant 0 : i32
    return %c0_i32, %c0_i32_0 : i32, i32
  }
  func.func @transform_4(%arg0: i32, %arg1: i32, %arg2: i32) -> (i32, i32) {
    %c0_i32 = arith.constant 0 : i32
    %c0_i32_0 = arith.constant 0 : i32
    %c0_i32_1 = arith.constant 0 : i32
    return %c0_i32, %c0_i32_0 : i32, i32
  }
  func.func @transform_5(%arg0: i32, %arg1: i32, %arg2: i32) -> (i32, i32) {
    %c0_i32 = arith.constant 0 : i32
    %c0_i32_0 = arith.constant 0 : i32
    %c0_i32_1 = arith.constant 0 : i32
    return %c0_i32, %c0_i32_0 : i32, i32
  }
  func.func @transform_6(%arg0: i32, %arg1: i32, %arg2: i32) -> (i32, i32) {
    %c0_i32 = arith.constant 0 : i32
    %c0_i32_0 = arith.constant 0 : i32
    %c0_i32_1 = arith.constant 0 : i32
    return %c0_i32, %c0_i32_0 : i32, i32
  }
  func.func @transform_7(%arg0: i32, %arg1: i32, %arg2: i32) -> (i32, i32) {
    %c0_i32 = arith.constant 0 : i32
    %c0_i32_0 = arith.constant 0 : i32
    %c0_i32_1 = arith.constant 0 : i32
    return %c0_i32, %c0_i32_0 : i32, i32
  }
  func.func @transform_8(%arg0: i32, %arg1: i32, %arg2: i32) -> (i32, i32) {
    %c0_i32 = arith.constant 0 : i32
    %c0_i32_0 = arith.constant 0 : i32
    %c0_i32_1 = arith.constant 0 : i32
    return %c0_i32, %c0_i32_0 : i32, i32
  }
  func.func @transform_9(%arg0: i32, %arg1: i32, %arg2: i32) -> (i32, i32) {
    %c0_i32 = arith.constant 0 : i32
    %c0_i32_0 = arith.constant 0 : i32
    %c0_i32_1 = arith.constant 0 : i32
    return %c0_i32, %c0_i32_0 : i32, i32
  }
  func.func @transform_10(%arg0: i32, %arg1: i32, %arg2: i32) -> (i32, i32) {
    %c0_i32 = arith.constant 0 : i32
    %c0_i32_0 = arith.constant 0 : i32
    %c0_i32_1 = arith.constant 0 : i32
    return %c0_i32, %c0_i32_0 : i32, i32
  }
  func.func @transform_11(%arg0: i32, %arg1: i32, %arg2: i32) -> (i32, i32) {
    %c0_i32 = arith.constant 0 : i32
    %c0_i32_0 = arith.constant 0 : i32
    %c0_i32_1 = arith.constant 0 : i32
    return %c0_i32, %c0_i32_0 : i32, i32
  }
  func.func @transform_12(%arg0: i32, %arg1: i32, %arg2: i32) -> (i32, i32) {
    %c0_i32 = arith.constant 0 : i32
    %c0_i32_0 = arith.constant 0 : i32
    %c0_i32_1 = arith.constant 0 : i32
    return %c0_i32, %c0_i32_0 : i32, i32
  }
  func.func @transform_13(%arg0: i32, %arg1: i32, %arg2: i32) -> (i32, i32) {
    %c0_i32 = arith.constant 0 : i32
    %c0_i32_0 = arith.constant 0 : i32
    %c0_i32_1 = arith.constant 0 : i32
    return %c0_i32, %c0_i32_0 : i32, i32
  }
  func.func @transform_14(%arg0: i32, %arg1: i32, %arg2: i32) -> (i32, i32) {
    %c0_i32 = arith.constant 0 : i32
    %c0_i32_0 = arith.constant 0 : i32
    %c0_i32_1 = arith.constant 0 : i32
    return %c0_i32, %c0_i32_0 : i32, i32
  }
  func.func @transform_15(%arg0: i32, %arg1: i32, %arg2: i32) -> (i32, i32) {
    %c0_i32 = arith.constant 0 : i32
    %c0_i32_0 = arith.constant 0 : i32
    %c0_i32_1 = arith.constant 0 : i32
    return %c0_i32, %c0_i32_0 : i32, i32
  }
  func.func @transform_16(%arg0: i32, %arg1: i32, %arg2: i32) -> (i32, i32) {
    %c0_i32 = arith.constant 0 : i32
    %c0_i32_0 = arith.constant 0 : i32
    %c0_i32_1 = arith.constant 0 : i32
    return %c0_i32, %c0_i32_0 : i32, i32
  }
  func.func @transform_17(%arg0: i32, %arg1: i32, %arg2: i32) -> (i32, i32, i32) {
    %0 = arith.muli %arg2, %arg1 : i32
    %c0_i32 = arith.constant 0 : i32
    %c0_i32_0 = arith.constant 0 : i32
    return %arg0, %0, %c0_i32 : i32, i32, i32
  }
}

</mosaic_0001>

<bundles_post_ra>
// kernel: tpu_custom_call.1
= control target key start
LH: loop header
LB: loop body
LE: loop exit
PB: predicated region body
PF: predicated region fallthrough
CT: control target
= control target key end

     0   :  { %s5776_s0 = inlined_call_operand.hbm [shape: f32[2,8,16], index: 0, kind: input, shape index: {}]   ;;  %s5777_s1 = inlined_call_operand.hbm [shape: f32[2,1,8], index: 1, kind: input, shape index: {}]   ;;  %s5778_s2 = inlined_call_operand.hbm [shape: bf16[2,256,32], index: 2, kind: input, shape index: {}]   ;;  %s5779_s3 = inlined_call_operand.hbm [shape: f32[16,32], index: 3, kind: input, shape index: {}]   ;;  %s5780_s4 = inlined_call_operand.hbm [shape: f32[1,32], index: 4, kind: input, shape index: {}]   ;;  %s5781_s5 = inlined_call_operand.hbm [shape: f32[32,32], index: 5, kind: input, shape index: {}]   ;;  %s5782_s6 = inlined_call_operand.hbm [shape: f32[1,32], index: 6, kind: input, shape index: {}]   ;;  %s5783_s7 = inlined_call_operand.hbm [shape: bf16[32,32], index: 7, kind: input, shape index: {}]   ;;  %s5784_s8 = inlined_call_operand.hbm [shape: f32[1,32], index: 8, kind: input, shape index: {}]   ;;  %s5785_s9 = inlined_call_operand.hbm [shape: f32[32,32], index: 9, kind: input, shape index: {}]   ;;  %s5786_s10 = inlined_call_operand.hbm [shape: f32[1,32], index: 10, kind: input, shape index: {}]   ;;  %s5787_s11 = inlined_call_operand.hbm [shape: f32[32,32], index: 11, kind: input, shape index: {}]   ;;  %s5788_s12 = inlined_call_operand.hbm [shape: f32[1,32], index: 12, kind: input, shape index: {}]   ;;  %s5789_s13 = inlined_call_operand.hbm [shape: f32[32,32], index: 13, kind: input, shape index: {}]   ;;  %s5790_s14 = inlined_call_operand.hbm [shape: f32[1,32], index: 14, kind: input, shape index: {}]   ;;  %s5791_s15 = inlined_call_operand.hbm [shape: bf16[32,32], index: 15, kind: input, shape index: {}]   ;;  %s5792_s16 = inlined_call_operand.hbm [shape: f32[1,32], index: 16, kind: input, shape index: {}]   ;;  %s5793_s17 = inlined_call_operand.hbm [shape: f32[2,256,32], index: 17, kind: output, shape index: {}]  }
   0x1   :  { %5842 = sst [smem:[#allocation68_spill]] %s5776_s0 }
   0x2   :  { %5843 = sst [smem:[#allocation69_spill]] %s5777_s1 }
   0x3   :  { %5844 = sst [smem:[#allocation70_spill]] %s5778_s2 }
   0x4   :  { %5845 = sst [smem:[#allocation71_spill]] %s5779_s3 }
   0x5   :  { %5846 = sst [smem:[#allocation72_spill]] %s5780_s4 }
   0x6   :  { %5847 = sst [smem:[#allocation73_spill]] %s5781_s5 }
   0x7   :  { %5848 = sst [smem:[#allocation74_spill]] %s5782_s6 }
   0x8   :  { %5849 = sst [smem:[#allocation75_spill]] %s5783_s7 }
   0x9   :  { %5850 = sst [smem:[#allocation76_spill]] %s5784_s8 }
   0xa   :  { %5851 = sst [smem:[#allocation77_spill]] %s5785_s9 }
   0xb   :  { %5852 = sst [smem:[#allocation78_spill]] %s5786_s10 }
   0xc   :  { %5853 = sst [smem:[#allocation79_spill]] %s5787_s11 }
   0xd   :  { %5854 = sst [smem:[#allocation80_spill]] %s5788_s12 }
   0xe   :  { %5855 = sst [smem:[#allocation81_spill]] %s5789_s13 }
   0xf   :  { %5856 = sst [smem:[#allocation82_spill]] %s5790_s14 }
  0x10   :  { %5857 = sst [smem:[#allocation83_spill]] %s5791_s15 }
  0x11   :  { %5858 = sst [smem:[#allocation84_spill]] %s5792_s16 }
  0x12   :  { %5859 = sst [smem:[#allocation85_spill]] %s5793_s17 }
  0x13   :  { %22 = vsyncpa [#allocation11], 0 }
  0x14   :  { %24 = vsyncpa [#allocation11 + $0x1], 0 }
  0x15   :  { %25 = vsyncpa [#allocation14], 0 }
  0x16   :  { %27 = vsyncpa [#allocation14 + $0x1], 0 }
  0x17   :  { %28 = vsyncpa [#allocation17], 0 }
  0x18   :  { %29 = vsyncpa [#allocation20], 0 }
  0x19   :  { %30 = vsyncpa [#allocation23], 0 }
  0x1a   :  { %31 = vsyncpa [#allocation26], 0 }
  0x1b   :  { %32 = vsyncpa [#allocation29], 0 }
  0x1c   :  { %33 = vsyncpa [#allocation32], 0 }
  0x1d   :  { %34 = vsyncpa [#allocation35], 0 }
  0x1e   :  { %35 = vsyncpa [#allocation12], 0 }
  0x1f   :  { %37 = vsyncpa [#allocation12 + $0x1], 0  ;;  %s4540_s24 = smov 0   ;;  %s4542_s25 = smov 0  }
  0x20   :  { %s4544_s26 = smov 0   ;;  %s4546_s27 = smov 0  }
  0x21   :  { %s4548_s28 = smov 0   ;;  %s4550_s29 = smov 0  }
  0x22   :  { %s4552_s0 = smov 0   ;;  %s4554_s30 = smov 0  }
  0x23   :  { %s4556_s18 = smov 0   ;;  %s4558_s19 = smov 0  }
  0x24   :  { %s4560_s1 = smov 0   ;;  %s4562_s20 = smov 0  }
  0x25   :  { %s4564_s21 = smov 0   ;;  %s4566_s22 = smov 0  }
  0x26   :  { %s4568_s23 = smov 0   ;;  %s4570_s17 = smov 0  }
  0x27 LB: > { %5860 = sst [smem:[#allocation49_spill]] %s4358_s24  ;;  %s4621_s2 = sadd.s32 4294967295, %s4418_s17   ;;  %s4418_s17 = sphi %s4570_s17, %s43_s17   ;;  %s4414_s23 = sphi %s4568_s23, %s5987_s23   ;;  %s4410_s22 = sphi %s4566_s22, %s5978_s22   ;;  %s4406_s21 = sphi %s4564_s21, %s5986_s21   ;;  %s4402_s20 = sphi %s4562_s20, %s5985_s20   ;;  %s4398_s1 = sphi %s4560_s1, %s5984_s1   ;;  %s4394_s19 = sphi %s4558_s19, %s5983_s19   ;;  %s4390_s18 = sphi %s4556_s18, %s5975_s18   ;;  %s4386_s30 = sphi %s4554_s30, %s5982_s30   ;;  %s4382_s0 = sphi %s4552_s0, %s5981_s0   ;;  %s4378_s29 = sphi %s4550_s29, %s5973_s29   ;;  %s4374_s28 = sphi %s4548_s28, %s5972_s28   ;;  %s4370_s27 = sphi %s4546_s27, %s5971_s27   ;;  %s4366_s26 = sphi %s4544_s26, %s5970_s26   ;;  %s4362_s25 = sphi %s4542_s25, %s5969_s25   ;;  %s4358_s24 = sphi %s4540_s24, %s5968_s24  }
  0x28   : > { %5861 = sst [smem:[#allocation50_spill]] %s4362_s25  ;;  %p2906_p0 = scmp.ge.s32.totalorder %s4418_s17, 1 }
  0x29   : > { %5862 = sst [smem:[#allocation51_spill]] %s4366_s26  ;;  %p5811_p1 = scmp.eq.s32.totalorder %s4621_s2, 0 }
  0x2a   : > { %5863 = sst [smem:[#allocation52_spill]] %s4370_s27  ;;  %p471_p2 = scmp.lt.s32.totalorder %s4418_s17, 9 }
  0x2b   : > { %5864 = sst [smem:[#allocation53_spill]] %s4374_s28  ;;  %s4421_s14 = smov [#allocation19]  }
  0x2c   : > { %5865 = sst [smem:[#allocation54_spill]] %s4378_s29  ;;  %p4626_p3 = pnand %p2906_p0, %p471_p2 }
  0x2d   : > { %5866 = sst [smem:[#allocation55_spill]] %s4390_s18  ;;  %s507_s12 = sshll.u32 %s4421_s14, 4  ;;  %s4640_s12 = int_to_ptr.vmem [resolvable:$true] %s507_s12 }
  0x2e   : > { %5867 = sst [smem:[#allocation56_spill]] %s4394_s19  ;;  %s4420_s19 = smov [#allocation16]  }
  0x2f   : > { %5868 = sst [smem:[#allocation57_spill]] %s4398_s1  ;;  %s483_s1 = sshll.u32 %s4420_s19, 4  ;;  %s4630_s1 = int_to_ptr.vmem [resolvable:$true] %s483_s1 }
  0x30   : > { %5869 = sst [smem:[#allocation58_spill]] %s4402_s20  ;;  %p3387_p4 = pneg %p4626_p3 }
  0x31   : > { %5870 = sst [smem:[#allocation59_spill]] %s4410_s22  ;;  %s4422_s10 = smov [#allocation22]  }
  0x32   : > { %s5871_s20 = scalar_select %p4626_p3, 1, 0 }
  0x33   : > { %p4636_p5 = pnand %p3387_p4, %p5811_p1  ;;  %s4642_s8 = sshll.u32 %s4422_s10, 4  ;;  %s532_s8 = int_to_ptr.vmem [resolvable:$true] %s4642_s8 }
  0x34   : > { %5872 = sst [smem:[#allocation60_spill]] %s5871_s20 }
  0x35   : > { %s5873_s16 = scalar_select %p4636_p5, 1, 0 }
  0x36   : > { %s5874_s3 = sld [smem:[#allocation71_spill]]  ;;  %p4652_p7 = pneg %p4636_p5 }
  0x3c   : > { %s3738_s19 = scalar_lea.hbm %s5874_s3, 256 }
  0x3d   : > { %p3739_p6 = scmp.ne.s32.totalorder %s5874_s3, %s3738_s19  ;;  %p3745_p10 = scmp.lt.u32.totalorder %s3738_s19, %s5874_s3 }
  0x3f   : > { %p3741_p8 = pnand %p4652_p7, %p3739_p6 }
  0x41   : > { %p3742_p9 = pneg %p3741_p8 }
  0x43   : > { %p3747_p11 = pnand %p3745_p10, %p3742_p9 }
  0x45   : > { %3750 = shalt.err (!%p3747_p11)
}
  0x46   : > { %s3751_s4 = scalar_lea.vmem %s4630_s1, 256  ;;  %p3759_p2 = scmp.lt.s32.totalorder %s4630_s1, %s4630_s1 }
  0x47   : > { %p3752_p12 = scmp.ne.s32.totalorder %s4630_s1, %s3751_s4  ;;  %p3760_p4 = scmp.lt.s32.totalorder %s3751_s4, %s3751_s4 }
  0x49   : > { %p3754_p13 = pnand %p3752_p12, %p4652_p7  ;;  %p3761_p6 = por %p3760_p4, %p3759_p2 }
  0x4b   : > { %p3755_p0 = pneg %p3754_p13 }
  0x4d   : > { %p3762_p8 = pnand %p3761_p6, %p3755_p0 }
  0x4f   : > { %3765 = shalt.err (!%p3762_p8)
}
  0x50   : > { %s5813_s6 = smov 128   ;;  %s5815_s24 = smov 8  }
  0x51   : > { %3390 = dma.hbm_to_vmem [thread:$0]  (!%p4636_p5), %s5874_s3, 256, %s4630_s1, [#allocation17], %s5813_s6, %s5813_s6, %s5815_s24  }
  0x52   : > { %s5876_s5 = sld [smem:[#allocation73_spill]] }
  0x58   : > { %s3766_s4 = scalar_lea.hbm %s5876_s5, 512 }
  0x59   : > { %p3767_p9 = scmp.ne.s32.totalorder %s5876_s5, %s3766_s4  ;;  %p3773_p12 = scmp.lt.u32.totalorder %s3766_s4, %s5876_s5 }
  0x5b   : > { %p3769_p10 = pnand %p3767_p9, %p4652_p7 }
  0x5d   : > { %p3770_p11 = pneg %p3769_p10 }
  0x5f   : > { %p3775_p13 = pnand %p3773_p12, %p3770_p11 }
  0x61   : > { %3778 = shalt.err (!%p3775_p13)
}
  0x62   : > { %s3779_s1 = scalar_lea.vmem %s4640_s12, 512  ;;  %p3787_p6 = scmp.lt.s32.totalorder %s4640_s12, %s4640_s12 }
  0x63   : > { %p3780_p0 = scmp.ne.s32.totalorder %s4640_s12, %s3779_s1  ;;  %p3788_p8 = scmp.lt.s32.totalorder %s3779_s1, %s3779_s1 }
  0x65   : > { %p3782_p2 = pnand %p3780_p0, %p4652_p7  ;;  %p3789_p9 = por %p3788_p8, %p3787_p6 }
  0x67   : > { %p3783_p4 = pneg %p3782_p2 }
  0x69   : > { %p3790_p10 = pnand %p3789_p9, %p3783_p4 }
  0x6b   : > { %3793 = shalt.err (!%p3790_p10)
}
  0x6c   : > { %3396 = dma.hbm_to_vmem [thread:$0]  (!%p4636_p5), %s5876_s5, 512, %s4640_s12, [#allocation20], %s5813_s6, %s5813_s6, %s5815_s24  }
  0x6d   : > { %s5877_s7 = sld [smem:[#allocation75_spill]] }
  0x73   : > { %s3794_s20 = scalar_lea.hbm %s5877_s7, 256 }
  0x74   : > { %p3795_p11 = scmp.ne.s32.totalorder %s5877_s7, %s3794_s20  ;;  %p3801_p0 = scmp.lt.u32.totalorder %s3794_s20, %s5877_s7 }
  0x76   : > { %p3797_p12 = pnand %p3795_p11, %p4652_p7 }
  0x78   : > { %p3798_p13 = pneg %p3797_p12 }
  0x7a   : > { %p3803_p2 = pnand %p3801_p0, %p3798_p13 }
  0x7c   : > { %3806 = shalt.err (!%p3803_p2)
}
  0x7d   : > { %s3807_s1 = scalar_lea.vmem %s532_s8, 256  ;;  %p3815_p9 = scmp.lt.s32.totalorder %s532_s8, %s532_s8 }
  0x7e   : > { %p3808_p4 = scmp.ne.s32.totalorder %s532_s8, %s3807_s1  ;;  %p3816_p10 = scmp.lt.s32.totalorder %s3807_s1, %s3807_s1 }
  0x80   : > { %p3810_p6 = pnand %p3808_p4, %p4652_p7  ;;  %p3817_p1 = por %p3816_p10, %p3815_p9 }
  0x82   : > { %p3811_p8 = pneg %p3810_p6 }
  0x84   : > { %p3818_p3 = pnand %p3817_p1, %p3811_p8 }
  0x86   : > { %3821 = shalt.err (!%p3818_p3)
}
  0x87   : > { %s5817_s12 = smov 64   ;;  %s5819_s26 = smov 4  }
  0x88   : > { %3402 = dma.hbm_to_vmem [thread:$0]  (!%p4636_p5), %s5877_s7, 256, %s532_s8, [#allocation23], %s5817_s12, %s5817_s12, %s5819_s26  }
  0x89   : > { %s4427_s29 = smov [#allocation25]   ;;  %s4428_s19 = smov [#allocation28]  }
  0x8a   : > { %s555_s20 = sshll.u32 %s4427_s29, 4  ;;  %s579_s14 = sshll.u32 %s4428_s19, 4  ;;  %s556_s20 = int_to_ptr.vmem [resolvable:$true] %s555_s20  ;;  %s580_s14 = int_to_ptr.vmem [resolvable:$true] %s579_s14 }
  0x8b   : > { %s5878_s9 = sld [smem:[#allocation77_spill]] }
  0x91   : > { %s3822_s1 = scalar_lea.hbm %s5878_s9, 512 }
  0x92   : > { %p3823_p1 = scmp.ne.s32.totalorder %s5878_s9, %s3822_s1  ;;  %p3829_p12 = scmp.lt.u32.totalorder %s3822_s1, %s5878_s9 }
  0x94   : > { %p3825_p3 = pnand %p3823_p1, %p4652_p7 }
  0x96   : > { %p3826_p11 = pneg %p3825_p3 }
  0x98   : > { %p3831_p13 = pnand %p3829_p12, %p3826_p11 }
  0x9a   : > { %3834 = shalt.err (!%p3831_p13)
}
  0x9b   : > { %s3835_s8 = scalar_lea.vmem %s556_s20, 512  ;;  %p3843_p6 = scmp.lt.s32.totalorder %s556_s20, %s556_s20 }
  0x9c   : > { %p3836_p0 = scmp.ne.s32.totalorder %s556_s20, %s3835_s8  ;;  %p3844_p8 = scmp.lt.s32.totalorder %s3835_s8, %s3835_s8 }
  0x9e   : > { %p3838_p2 = pnand %p3836_p0, %p4652_p7  ;;  %p3845_p9 = por %p3844_p8, %p3843_p6 }
  0xa0   : > { %p3839_p4 = pneg %p3838_p2 }
  0xa2   : > { %p3846_p10 = pnand %p3845_p9, %p3839_p4 }
  0xa4   : > { %3849 = shalt.err (!%p3846_p10)
}
  0xa5   : > { %s5879_s6 = smov 8   ;;  %s5880_s24 = smov 128  }
  0xa6   : > { %3408 = dma.hbm_to_vmem [thread:$0]  (!%p4636_p5), %s5878_s9, 512, %s556_s20, [#allocation26], %s5880_s24, %s5880_s24, %s5879_s6  }
  0xa7   : > { %s5881_s11 = sld [smem:[#allocation79_spill]] }
  0xad   : > { %s3850_s29 = scalar_lea.hbm %s5881_s11, 512 }
  0xae   : > { %p3851_p1 = scmp.ne.s32.totalorder %s5881_s11, %s3850_s29  ;;  %p3857_p12 = scmp.lt.u32.totalorder %s3850_s29, %s5881_s11 }
  0xb0   : > { %p3853_p3 = pnand %p3851_p1, %p4652_p7 }
  0xb2   : > { %p3854_p11 = pneg %p3853_p3 }
  0xb4   : > { %p3859_p13 = pnand %p3857_p12, %p3854_p11 }
  0xb6   : > { %3862 = shalt.err (!%p3859_p13)
}
  0xb7   : > { %s3863_s8 = scalar_lea.vmem %s580_s14, 512  ;;  %p3871_p6 = scmp.lt.s32.totalorder %s580_s14, %s580_s14 }
  0xb8   : > { %p3864_p0 = scmp.ne.s32.totalorder %s580_s14, %s3863_s8  ;;  %p3872_p8 = scmp.lt.s32.totalorder %s3863_s8, %s3863_s8 }
  0xba   : > { %p3866_p2 = pnand %p3864_p0, %p4652_p7  ;;  %p3873_p9 = por %p3872_p8, %p3871_p6 }
  0xbc   : > { %p3867_p4 = pneg %p3866_p2 }
  0xbe   : > { %p3874_p10 = pnand %p3873_p9, %p3867_p4 }
  0xc0   : > { %3877 = shalt.err (!%p3874_p10)
}
  0xc1   : > { %3414 = dma.hbm_to_vmem [thread:$0]  (!%p4636_p5), %s5881_s11, 512, %s580_s14, [#allocation29], %s5880_s24, %s5880_s24, %s5879_s6  }
  0xc2   : > { %s4429_s5 = smov [#allocation31]   ;;  %s4430_s28 = smov [#allocation34]  }
  0xc3   : > { %s603_s27 = sshll.u32 %s4429_s5, 4  ;;  %s627_s29 = sshll.u32 %s4430_s28, 4  ;;  %s604_s27 = int_to_ptr.vmem [resolvable:$true] %s603_s27  ;;  %s628_s29 = int_to_ptr.vmem [resolvable:$true] %s627_s29 }
  0xc4   : > { %s5882_s13 = sld [smem:[#allocation81_spill]] }
  0xca   : > { %s3878_s4 = scalar_lea.hbm %s5882_s13, 512 }
  0xcb   : > { %p3879_p1 = scmp.ne.s32.totalorder %s5882_s13, %s3878_s4  ;;  %p3885_p12 = scmp.lt.u32.totalorder %s3878_s4, %s5882_s13 }
  0xcd   : > { %p3881_p3 = pnand %p3879_p1, %p4652_p7 }
  0xcf   : > { %p3882_p11 = pneg %p3881_p3 }
  0xd1   : > { %p3887_p13 = pnand %p3885_p12, %p3882_p11 }
  0xd3   : > { %3890 = shalt.err (!%p3887_p13)
}
  0xd4   : > { %s3891_s14 = scalar_lea.vmem %s604_s27, 512  ;;  %p3899_p6 = scmp.lt.s32.totalorder %s604_s27, %s604_s27 }
  0xd5   : > { %p3892_p0 = scmp.ne.s32.totalorder %s604_s27, %s3891_s14  ;;  %p3900_p8 = scmp.lt.s32.totalorder %s3891_s14, %s3891_s14 }
  0xd7   : > { %p3894_p2 = pnand %p3892_p0, %p4652_p7  ;;  %p3901_p9 = por %p3900_p8, %p3899_p6 }
  0xd9   : > { %p3895_p4 = pneg %p3894_p2 }
  0xdb   : > { %p3902_p10 = pnand %p3901_p9, %p3895_p4 }
  0xdd   : > { %3905 = shalt.err (!%p3902_p10)
}
  0xde   : > { %3420 = dma.hbm_to_vmem [thread:$0]  (!%p4636_p5), %s5882_s13, 512, %s604_s27, [#allocation32], %s5880_s24, %s5880_s24, %s5879_s6  }
  0xdf   : > { %s5883_s15 = sld [smem:[#allocation83_spill]] }
  0xe5   : > { %s3906_s19 = scalar_lea.hbm %s5883_s15, 256 }
  0xe6   : > { %p3907_p1 = scmp.ne.s32.totalorder %s5883_s15, %s3906_s19  ;;  %p3913_p12 = scmp.lt.u32.totalorder %s3906_s19, %s5883_s15 }
  0xe8   : > { %p3909_p3 = pnand %p3907_p1, %p4652_p7 }
  0xea   : > { %p3910_p11 = pneg %p3909_p3 }
  0xec   : > { %p3915_p13 = pnand %p3913_p12, %p3910_p11 }
  0xee   : > { %3918 = shalt.err (!%p3915_p13)
}
  0xef   : > { %s3919_s20 = scalar_lea.vmem %s628_s29, 256  ;;  %p3927_p6 = scmp.lt.s32.totalorder %s628_s29, %s628_s29 }
  0xf0   : > { %p3920_p0 = scmp.ne.s32.totalorder %s628_s29, %s3919_s20  ;;  %p3928_p8 = scmp.lt.s32.totalorder %s3919_s20, %s3919_s20 }
  0xf2   : > { %p3922_p2 = pnand %p3920_p0, %p4652_p7  ;;  %p3929_p9 = por %p3928_p8, %p3927_p6 }
  0xf4   : > { %p3923_p4 = pneg %p3922_p2 }
  0xf6   : > { %p3930_p10 = pnand %p3929_p9, %p3923_p4 }
  0xf8   : > { %3933 = shalt.err (!%p3930_p10)
}
  0xf9   : > { %s5884_s6 = smov 64   ;;  %s55_s12 = sadd.s32 1, %s4406_s21 }
  0xfa   : > { %3426 = dma.hbm_to_vmem [thread:$0]  (!%p4636_p5), %s5883_s15, 256, %s628_s29, [#allocation35], %s5884_s6, %s5884_s6, %s5819_s26  }
  0xfb   : > { %s5885_s3 = sld [smem:[#allocation54_spill]]  ;;  %s58_s5 = sadd.s32 1, %s4410_s22 }
  0xfc   : > { %s5886_s28 = sld [smem:[#allocation53_spill]]  ;;  %p56_p1 = scmp.ge.s32.totalorder %s55_s12, 2 }
  0xfd   : > { %s62_s19 = sadd.s32 1, %s4414_s23  ;;  %s5887_s10 = sld [smem:[#allocation52_spill]] }
  0xfe   : > { %s69_s4 = sadd.s32 1, %s4390_s18  ;;  %p76_p3 = scmp.ne.s32.totalorder %s4390_s18, %s4386_s30 }
  0xff   : > { %s5989_s12 = smov (%p56_p1, %s55_s12), 0  ;;  %s5991_s5 = smov (!%p56_p1, %s58_s5), %s4410_s22 }
 0x100   : > { %5888 = sst [smem:[#allocation61_spill]] %s5989_s12  ;;  %p77_p11 = scmp.eq.s32.totalorder %s4418_s17, 0 }
 0x101   : > { %p82_p12 = scmp.ne.s32.totalorder %s4386_s30, %s4382_s0  ;;  %p60_p13 = scmp.ge.s32.totalorder %s5991_s5, 2 }
 0x102   : > { %s5889_s29 = sld [smem:[#allocation51_spill]]  ;;  %s119_s1 = ssub.s32 %s4406_s21, %s5989_s12 }
 0x103   : > { %p4823_p0 = por %p77_p11, %p76_p3  ;;  %p5891_p2 = scmp.eq.s32.totalorder %s4621_s2, 0 }
 0x104   : > { %s5993_s5 = smov (%p60_p13, %s5991_s5), 0  ;;  %s5995_s19 = smov (!%p60_p13, %s62_s19), %s4414_s23 }
 0x105   : > { %p4829_p4 = por %p5891_p2, %p82_p12  ;;  %5894 = sst [smem:[#allocation62_spill]] %s5993_s5 }
 0x106   : > { %s123_s24 = sadd.s32 1, %s5885_s3  ;;  %p130_p6 = scmp.ne.s32.totalorder %s5885_s3, %s5886_s28 }
 0x107   : > { %s5892_s20 = scalar_select %p4829_p4, 1, 0 }
 0x108   : > { %p64_p8 = scmp.ge.s32.totalorder %s5995_s19, 2  ;;  %s5895_s0 = sld [smem:[#allocation50_spill]] }
 0x109   : > { %5893 = sst [smem:[#allocation52_spill]] %s5892_s20  ;;  %p136_p9 = scmp.ne.s32.totalorder %s5886_s28, %s5887_s10 }
 0x10a   : > { %p4841_p10 = por %p130_p6, %p77_p11  ;;  %s440_s26 = smul.u32 %s4406_s21, %s4410_s22 }
 0x10b   : > { %s5897_s14 = sld [smem:[#allocation49_spill]]  ;;  %s5997_s19 = smov (%p64_p8, %s5995_s19), 0 }
 0x10c   : > { %5898 = sst [smem:[#allocation63_spill]] %s5997_s19  ;;  %p5899_p1 = pmov %p5891_p2 }
 0x10d   : > { %s441_s9 = smul.u32 %s5993_s5, %s5989_s12  ;;  %s66_s28 = ssub.s32 %s4414_s23, %s5997_s19 }
 0x10e   : > { %p4851_p3 = por %p136_p9, %p5899_p1  ;;  %s447_s10 = sadd.s32 1, %s5889_s29 }
 0x10f   : > { %p67_p11 = scmp.eq.s32.totalorder %s66_s28, 0  ;;  %s120_s11 = sor.u32 %s119_s1, %s66_s28 }
 0x110   : > { %s5900_s7 = scalar_select %p4851_p3, 1, 0 }
 0x111   : > { %p121_p12 = scmp.eq.s32.totalorder %s120_s11, 0  ;;  %s443_s13 = ssub.s32 %s440_s26, %s441_s9 }
 0x112   : > { %s4861_s15 = scalar_select %p67_p11, %s4390_s18, %s69_s4  }
 0x113   : > { %s4864_s22 = scalar_select %p121_p12, %s5885_s3, %s123_s24  }
 0x114   : > { %5901 = sst [smem:[#allocation64_spill]] %s4861_s15  ;;  %s444_s20 = sor.u32 %s443_s13, %s66_s28 }
 0x115   : > { %5902 = sst [smem:[#allocation65_spill]] %s4864_s22  ;;  %p457_p13 = scmp.ne.s32.totalorder %s5889_s29, %s5895_s0 }
 0x116   : > { %p445_p2 = scmp.eq.s32.totalorder %s444_s20, 0  ;;  %p458_p6 = scmp.eq.s32.totalorder %s4621_s2, 7 }
 0x117   : > { %p463_p8 = scmp.ne.s32.totalorder %s5895_s0, %s5897_s14  ;;  %s5903_s19 = sadd.s32 4294967294, %s4418_s17  }
 0x118   : > { %p464_p9 = scmp.eq.s32.totalorder %s5903_s19, 7  ;;  %s5999_s29 = smov (!%p445_p2, %s5889_s29), %s447_s10 }
 0x119   : > { %5904 = sst [smem:[#allocation66_spill]] %s5999_s29  ;;  %p4876_p1 = por %p458_p6, %p457_p13 }
 0x11a   : > { %p4880_p3 = por %p464_p9, %p463_p8  ;;  %p3458_p11 = scmp.lt.s32.totalorder %s4418_s17, 8 }
 0x11b   : > { %s5905_s1 = scalar_select %p4876_p1, 1, 0 }
 0x11c   : > { %s5906_s9 = scalar_select %p4880_p3, 1, 0 }
 0x11d   : > { %s4886_s11 = sand.u32 1, %s4390_s18   ;;  %s670_s13 = sand.u32 1, %s4418_s17  }
 0x11e   : > { %5907 = sst [smem:[#allocation67_spill]] %s5906_s9  ;;  %p4891_p12 = pnand %p3458_p11, %p4823_p0 }
 0x11f   : > { %s2924_s14 = sshll.u32 %s4414_s23, 4  ;;  %s673_s19 = scalar_lea.vmem [#allocation13], %s4886_s11 }
 0x120   : > { %s5908_s26 = scalar_select %p4891_p12, 1, 0 }
 0x121   : > { %s680_s4 = sshll.u32 %s673_s19, 4  ;;  %s5909_s0 = sld [smem:[#allocation69_spill]]  ;;  %s4902_s4 = int_to_ptr.vmem [resolvable:$true] %s680_s4 }
 0x122   : > { %p4906_p0 = pnand %p3458_p11, %p4841_p10  ;;  %s4910_s5 = scalar_lea.sflag [#allocation14], %s670_s13 }
 0x123   : > { %p5834_p2 = pneg %p4891_p12 }
 0x124   : > { %s5911_s8 = scalar_select %p4906_p0, 1, 0 }
 0x127   : > { %s5910_s10 = smov %s5909_s0  ;;  %s4900_s28 = scalar_lea.hbm %s5909_s0, %s2924_s14 }
 0x128   : > { %s3934_s12 = scalar_lea.hbm %s4900_s28, 16  ;;  %s3939_s20 = scalar_lea.hbm %s5910_s10, 32 }
 0x129   : > { %p3935_p13 = scmp.ne.s32.totalorder %s4900_s28, %s3934_s12  ;;  %p3940_p10 = scmp.lt.u32.totalorder %s4900_s28, %s5910_s10 }
 0x12a   : > { %p3941_p9 = scmp.lt.u32.totalorder %s3939_s20, %s3934_s12  ;;  %p3943_p3 = scmp.lt.u32.totalorder %s3934_s12, %s4900_s28 }
 0x12b   : > { %p3937_p6 = pnand %p5834_p2, %p3935_p13 }
 0x12c   : > { %p3942_p11 = por %p3941_p9, %p3940_p10 }
 0x12d   : > { %p3938_p8 = pneg %p3937_p6 }
 0x12e   : > { %p3944_p1 = por %p3943_p3, %p3942_p11 }
 0x130   : > { %p3945_p4 = pnand %p3944_p1, %p3938_p8 }
 0x132   : > { %3948 = shalt.err (!%p3945_p4)
}
 0x133   : > { %s3949_s13 = scalar_lea.vmem %s4902_s4, 16  ;;  %s4431_s0 = smov [#allocation13]  }
 0x134   : > { %p3950_p13 = scmp.ne.s32.totalorder %s4902_s4, %s3949_s13  ;;  %s3954_s14 = sshll.u32 %s4431_s0, 4  ;;  %s3955_s14 = int_to_ptr.vmem [resolvable:$false] %s3954_s14 }
 0x135   : > { %s3956_s19 = scalar_lea.vmem %s3955_s14, 32  ;;  %p3957_p5 = scmp.lt.s32.totalorder %s4902_s4, %s3955_s14 }
 0x136   : > { %p3952_p6 = pnand %p3950_p13, %p5834_p2  ;;  %p3958_p10 = scmp.lt.s32.totalorder %s3956_s19, %s3949_s13 }
 0x138   : > { %p3953_p0 = pneg %p3952_p6  ;;  %p3959_p9 = por %p3958_p10, %p3957_p5 }
 0x13a   : > { %p3960_p3 = pnand %p3959_p9, %p3953_p0 }
 0x13c   : > { %3963 = shalt.err (!%p3960_p3)
}
 0x13d   : > { %3436 = dma.hbm_to_vmem [thread:$0]  (!%p4891_p12), %s4900_s28, 16, %s4902_s4, %s4910_s5  }
 0x13e   : > { %s4432_s12 = smov [#allocation18]   ;;  %s4433_s24 = smov [#allocation21]  }
 0x13f   : > { %s497_s20 = sshll.u32 %s4432_s12, 4  ;;  %s521_s27 = sshll.u32 %s4433_s24, 4  ;;  %s498_s20 = int_to_ptr.vmem [resolvable:$true] %s497_s20  ;;  %s522_s27 = int_to_ptr.vmem [resolvable:$true] %s521_s27 }
 0x140   : > { %s5912_s15 = sld [smem:[#allocation72_spill]] }
 0x146   : > { %s3964_s14 = scalar_lea.hbm %s5912_s15, 16 }
 0x147   : > { %p3965_p5 = scmp.ne.s32.totalorder %s5912_s15, %s3964_s14  ;;  %p3971_p0 = scmp.lt.u32.totalorder %s3964_s14, %s5912_s15 }
 0x149   : > { %p3967_p4 = pnand %p3965_p5, %p4652_p7 }
 0x14b   : > { %p3968_p1 = pneg %p3967_p4 }
 0x14d   : > { %p3973_p8 = pnand %p3971_p0, %p3968_p1 }
 0x14f   : > { %3976 = shalt.err (!%p3973_p8)
}
 0x150   : > { %s3977_s4 = scalar_lea.vmem %s498_s20, 16  ;;  %s3984_s10 = scalar_lea.vmem %s498_s20, 32 }
 0x151   : > { %p3978_p11 = scmp.ne.s32.totalorder %s498_s20, %s3977_s4  ;;  %p3985_p10 = scmp.lt.s32.totalorder %s498_s20, %s498_s20 }
 0x152   : > { %p3986_p9 = scmp.lt.s32.totalorder %s3984_s10, %s3977_s4 }
 0x153   : > { %p3980_p13 = pnand %p3978_p11, %p4652_p7 }
 0x154   : > { %p3987_p3 = por %p3986_p9, %p3985_p10 }
 0x155   : > { %p3981_p6 = pneg %p3980_p13 }
 0x157   : > { %p3988_p2 = pnand %p3987_p3, %p3981_p6 }
 0x159   : > { %3991 = shalt.err (!%p3988_p2)
}
 0x15a   : > { %p5913_p5 = scmp.ne.s32.totalorder %s5873_s16, 0  ;;  %s5914_s24 = sld [smem:[#allocation74_spill]] }
 0x15c   : > { %3393 = dma.hbm_to_vmem [thread:$0]  (!%p5913_p5), %s5912_s15, 16, %s498_s20, [#allocation17]  }
 0x160   : > { %s5915_s14 = smov %s5914_s24  ;;  %s3992_s0 = scalar_lea.hbm %s5914_s24, 16 }
 0x161   : > { %p3993_p4 = scmp.ne.s32.totalorder %s5915_s14, %s3992_s0  ;;  %p3999_p2 = scmp.lt.u32.totalorder %s3992_s0, %s5915_s14 }
 0x163   : > { %p3995_p1 = pnand %p3993_p4, %p4652_p7 }
 0x165   : > { %p3996_p0 = pneg %p3995_p1 }
 0x167   : > { %p4001_p8 = pnand %p3999_p2, %p3996_p0 }
 0x169   : > { %4004 = shalt.err (!%p4001_p8)
}
 0x16a   : > { %s4005_s28 = scalar_lea.vmem %s522_s27, 16  ;;  %s4012_s20 = scalar_lea.vmem %s522_s27, 32 }
 0x16b   : > { %p4006_p11 = scmp.ne.s32.totalorder %s522_s27, %s4005_s28  ;;  %p4013_p10 = scmp.lt.s32.totalorder %s522_s27, %s522_s27 }
 0x16c   : > { %p4014_p9 = scmp.lt.s32.totalorder %s4012_s20, %s4005_s28 }
 0x16d   : > { %p4008_p13 = pnand %p4006_p11, %p4652_p7 }
 0x16e   : > { %p4015_p3 = por %p4014_p9, %p4013_p10 }
 0x16f   : > { %p4009_p6 = pneg %p4008_p13 }
 0x171   : > { %p4016_p12 = pnand %p4015_p3, %p4009_p6 }
 0x173   : > { %4019 = shalt.err (!%p4016_p12)
}
 0x174   : > { %3399 = dma.hbm_to_vmem [thread:$0]  (!%p5913_p5), %s5915_s14, 16, %s522_s27, [#allocation20]  }
 0x175   : > { %s4434_s22 = smov [#allocation24]   ;;  %s4435_s0 = smov [#allocation27]  }
 0x176   : > { %s545_s24 = sshll.u32 %s4434_s22, 4  ;;  %s569_s13 = sshll.u32 %s4435_s0, 4  ;;  %s546_s24 = int_to_ptr.vmem [resolvable:$true] %s545_s24  ;;  %s570_s13 = int_to_ptr.vmem [resolvable:$true] %s569_s13 }
 0x177   : > { %s5916_s10 = sld [smem:[#allocation76_spill]] }
 0x17d   : > { %s4020_s15 = scalar_lea.hbm %s5916_s10, 16 }
 0x17e   : > { %p4021_p12 = scmp.ne.s32.totalorder %s5916_s10, %s4020_s15  ;;  %p4027_p0 = scmp.lt.u32.totalorder %s4020_s15, %s5916_s10 }
 0x180   : > { %p4023_p4 = pnand %p4021_p12, %p4652_p7 }
 0x182   : > { %p4024_p1 = pneg %p4023_p4 }
 0x184   : > { %p4029_p2 = pnand %p4027_p0, %p4024_p1 }
 0x186   : > { %4032 = shalt.err (!%p4029_p2)
}
 0x187   : > { %s4033_s27 = scalar_lea.vmem %s546_s24, 16  ;;  %s4040_s18 = scalar_lea.vmem %s546_s24, 32 }
 0x188   : > { %p4034_p8 = scmp.ne.s32.totalorder %s546_s24, %s4033_s27  ;;  %p4041_p6 = scmp.lt.s32.totalorder %s546_s24, %s546_s24 }
 0x189   : > { %p4042_p10 = scmp.lt.s32.totalorder %s4040_s18, %s4033_s27 }
 0x18a   : > { %p4036_p11 = pnand %p4034_p8, %p4652_p7 }
 0x18b   : > { %p4043_p9 = por %p4042_p10, %p4041_p6 }
 0x18c   : > { %p4037_p13 = pneg %p4036_p11 }
 0x18e   : > { %p4044_p3 = pnand %p4043_p9, %p4037_p13 }
 0x190   : > { %4047 = shalt.err (!%p4044_p3)
}
 0x191   : > { %3405 = dma.hbm_to_vmem [thread:$0]  (!%p5913_p5), %s5916_s10, 16, %s546_s24, [#allocation23]  }
 0x192   : > { %s5917_s19 = sld [smem:[#allocation78_spill]] }
 0x198   : > { %s5918_s4 = smov %s5917_s19  ;;  %s4048_s28 = scalar_lea.hbm %s5917_s19, 16 }
 0x199   : > { %p4049_p12 = scmp.ne.s32.totalorder %s5918_s4, %s4048_s28  ;;  %p4055_p0 = scmp.lt.u32.totalorder %s4048_s28, %s5918_s4 }
 0x19b   : > { %p4051_p4 = pnand %p4049_p12, %p4652_p7 }
 0x19d   : > { %p4052_p1 = pneg %p4051_p4 }
 0x19f   : > { %p4057_p2 = pnand %p4055_p0, %p4052_p1 }
 0x1a1   : > { %4060 = shalt.err (!%p4057_p2)
}
 0x1a2   : > { %s4061_s22 = scalar_lea.vmem %s570_s13, 16  ;;  %s4068_s24 = scalar_lea.vmem %s570_s13, 32 }
 0x1a3   : > { %p4062_p8 = scmp.ne.s32.totalorder %s570_s13, %s4061_s22  ;;  %p4069_p6 = scmp.lt.s32.totalorder %s570_s13, %s570_s13 }
 0x1a4   : > { %p4070_p10 = scmp.lt.s32.totalorder %s4068_s24, %s4061_s22 }
 0x1a5   : > { %p4064_p11 = pnand %p4062_p8, %p4652_p7 }
 0x1a6   : > { %p4071_p9 = por %p4070_p10, %p4069_p6 }
 0x1a7   : > { %p4065_p13 = pneg %p4064_p11 }
 0x1a9   : > { %p4072_p3 = pnand %p4071_p9, %p4065_p13 }
 0x1ab   : > { %4075 = shalt.err (!%p4072_p3)
}
 0x1ac   : > { %3411 = dma.hbm_to_vmem [thread:$0]  (!%p5913_p5), %s5918_s4, 16, %s570_s13, [#allocation26]  }
 0x1ad   : > { %s4436_s29 = smov [#allocation30]   ;;  %s4437_s28 = smov [#allocation33]  }
 0x1ae   : > { %s593_s19 = sshll.u32 %s4436_s29, 4  ;;  %s617_s20 = sshll.u32 %s4437_s28, 4  ;;  %s594_s19 = int_to_ptr.vmem [resolvable:$true] %s593_s19  ;;  %s618_s20 = int_to_ptr.vmem [resolvable:$true] %s617_s20 }
 0x1af   : > { %s5919_s18 = sld [smem:[#allocation80_spill]] }
 0x1b5   : > { %s5920_s10 = smov %s5919_s18  ;;  %s4076_s14 = scalar_lea.hbm %s5919_s18, 16 }
 0x1b6   : > { %p4077_p12 = scmp.ne.s32.totalorder %s5920_s10, %s4076_s14  ;;  %p4083_p0 = scmp.lt.u32.totalorder %s4076_s14, %s5920_s10 }
 0x1b8   : > { %p4079_p4 = pnand %p4077_p12, %p4652_p7 }
 0x1ba   : > { %p4080_p1 = pneg %p4079_p4 }
 0x1bc   : > { %p4085_p2 = pnand %p4083_p0, %p4080_p1 }
 0x1be   : > { %4088 = shalt.err (!%p4085_p2)
}
 0x1bf   : > { %s4089_s13 = scalar_lea.vmem %s594_s19, 16  ;;  %s4096_s15 = scalar_lea.vmem %s594_s19, 32 }
 0x1c0   : > { %p4090_p8 = scmp.ne.s32.totalorder %s594_s19, %s4089_s13  ;;  %p4097_p6 = scmp.lt.s32.totalorder %s594_s19, %s594_s19 }
 0x1c1   : > { %p4098_p10 = scmp.lt.s32.totalorder %s4096_s15, %s4089_s13 }
 0x1c2   : > { %p4092_p11 = pnand %p4090_p8, %p4652_p7 }
 0x1c3   : > { %p4099_p9 = por %p4098_p10, %p4097_p6 }
 0x1c4   : > { %p4093_p13 = pneg %p4092_p11 }
 0x1c6   : > { %p4100_p3 = pnand %p4099_p9, %p4093_p13 }
 0x1c8   : > { %4103 = shalt.err (!%p4100_p3)
}
 0x1c9   : > { %3417 = dma.hbm_to_vmem [thread:$0]  (!%p5913_p5), %s5920_s10, 16, %s594_s19, [#allocation29]  }
 0x1ca   : > { %s5921_s12 = sld [smem:[#allocation82_spill]] }
 0x1d0   : > { %s4104_s27 = scalar_lea.hbm %s5921_s12, 16 }
 0x1d1   : > { %p4105_p12 = scmp.ne.s32.totalorder %s5921_s12, %s4104_s27  ;;  %p4111_p0 = scmp.lt.u32.totalorder %s4104_s27, %s5921_s12 }
 0x1d3   : > { %p4107_p4 = pnand %p4105_p12, %p4652_p7 }
 0x1d5   : > { %p4108_p1 = pneg %p4107_p4 }
 0x1d7   : > { %p4113_p2 = pnand %p4111_p0, %p4108_p1 }
 0x1d9   : > { %4116 = shalt.err (!%p4113_p2)
}
 0x1da   : > { %s4117_s13 = scalar_lea.vmem %s618_s20, 16  ;;  %s4124_s19 = scalar_lea.vmem %s618_s20, 32 }
 0x1db   : > { %p4118_p8 = scmp.ne.s32.totalorder %s618_s20, %s4117_s13  ;;  %p4125_p6 = scmp.lt.s32.totalorder %s618_s20, %s618_s20 }
 0x1dc   : > { %p4126_p10 = scmp.lt.s32.totalorder %s4124_s19, %s4117_s13 }
 0x1dd   : > { %p4120_p11 = pnand %p4118_p8, %p4652_p7 }
 0x1de   : > { %p4127_p9 = por %p4126_p10, %p4125_p6 }
 0x1df   : > { %p4121_p13 = pneg %p4120_p11 }
 0x1e1   : > { %p4128_p3 = pnand %p4127_p9, %p4121_p13 }
 0x1e3   : > { %4131 = shalt.err (!%p4128_p3)
}
 0x1e4   : > { %3423 = dma.hbm_to_vmem [thread:$0]  (!%p5913_p5), %s5921_s12, 16, %s618_s20, [#allocation32]  }
 0x1e5   : > { %s4438_s28 = smov [#allocation36]   ;;  %s2922_s14 = sshll.u32 %s4886_s11, 3 }
 0x1e6   : > { %s641_s9 = sshll.u32 %s4438_s28, 4  ;;  %s5922_s22 = sld [smem:[#allocation84_spill]]  ;;  %s642_s9 = int_to_ptr.vmem [resolvable:$true] %s641_s9 }
 0x1ec   : > { %s5923_s4 = smov %s5922_s22  ;;  %s4132_s24 = scalar_lea.hbm %s5922_s22, 16 }
 0x1ed   : > { %p4133_p12 = scmp.ne.s32.totalorder %s5923_s4, %s4132_s24  ;;  %p4139_p0 = scmp.lt.u32.totalorder %s4132_s24, %s5923_s4 }
 0x1ef   : > { %p4135_p4 = pnand %p4133_p12, %p4652_p7 }
 0x1f1   : > { %p4136_p1 = pneg %p4135_p4 }
 0x1f3   : > { %p4141_p2 = pnand %p4139_p0, %p4136_p1 }
 0x1f5   : > { %4144 = shalt.err (!%p4141_p2)
}
 0x1f6   : > { %s4145_s20 = scalar_lea.vmem %s642_s9, 16  ;;  %s4152_s29 = scalar_lea.vmem %s642_s9, 32 }
 0x1f7   : > { %p4146_p8 = scmp.ne.s32.totalorder %s642_s9, %s4145_s20  ;;  %p4153_p6 = scmp.lt.s32.totalorder %s642_s9, %s642_s9 }
 0x1f8   : > { %p4154_p10 = scmp.lt.s32.totalorder %s4152_s29, %s4145_s20 }
 0x1f9   : > { %p4148_p11 = pnand %p4146_p8, %p4652_p7 }
 0x1fa   : > { %p4155_p9 = por %p4154_p10, %p4153_p6 }
 0x1fb   : > { %p4149_p13 = pneg %p4148_p11 }
 0x1fd   : > { %p4156_p3 = pnand %p4155_p9, %p4149_p13 }
 0x1ff   : > { %4159 = shalt.err (!%p4156_p3)
}
 0x200   : > { %3429 = dma.hbm_to_vmem [thread:$0]  (!%p5913_p5), %s5923_s4, 16, %s642_s9, [#allocation35]  }
 0x201   : > { %s2923_s18 = sshll.u32 %s4414_s23, 7  ;;  %s5924_s24 = sld [smem:[#allocation68_spill]] }
 0x202   : > { %s656_s19 = scalar_lea.vmem [#allocation10], %s2922_s14  ;;  %s689_s15 = sand.u32 1, %s5885_s3  }
 0x203   : > { %s663_s16 = sshll.u32 %s656_s19, 4  ;;  %s653_s20 = scalar_lea.sflag [#allocation11], %s4886_s11  ;;  %s5071_s16 = int_to_ptr.vmem [resolvable:$true] %s663_s16 }
 0x204   : > { %p5926_p12 = scmp.ne.s32.totalorder %s5908_s26, 0 }
 0x206   : > { %p5927_p5 = pneg %p5926_p12 }
 0x207   : > { %s5925_s13 = smov %s5924_s24  ;;  %s5069_s0 = scalar_lea.hbm %s5924_s24, %s2923_s18 }
 0x208   : > { %s4160_s29 = scalar_lea.hbm %s5069_s0, 128  ;;  %s4165_s27 = scalar_lea.hbm %s5925_s13, 256 }
 0x209   : > { %p4161_p7 = scmp.ne.s32.totalorder %s5069_s0, %s4160_s29  ;;  %p4166_p0 = scmp.lt.u32.totalorder %s5069_s0, %s5925_s13 }
 0x20a   : > { %p4167_p2 = scmp.lt.u32.totalorder %s4165_s27, %s4160_s29  ;;  %p4169_p11 = scmp.lt.u32.totalorder %s4160_s29, %s5069_s0 }
 0x20b   : > { %p4163_p4 = pnand %p4161_p7, %p5927_p5 }
 0x20c   : > { %p4168_p8 = por %p4167_p2, %p4166_p0 }
 0x20d   : > { %p4164_p1 = pneg %p4163_p4 }
 0x20e   : > { %p4170_p13 = por %p4169_p11, %p4168_p8 }
 0x210   : > { %p4171_p6 = pnand %p4170_p13, %p4164_p1 }
 0x212   : > { %4174 = shalt.err (!%p4171_p6)
}
 0x213   : > { %s4175_s11 = scalar_lea.vmem %s5071_s16, 128  ;;  %p5928_p9 = pmov %p5927_p5 }
 0x214   : > { %p4176_p10 = scmp.ne.s32.totalorder %s5071_s16, %s4175_s11  ;;  %s4439_s14 = smov [#allocation10]  }
 0x215   : > { %s4180_s22 = sshll.u32 %s4439_s14, 4  ;;  %s4181_s22 = int_to_ptr.vmem [resolvable:$false] %s4180_s22 }
 0x216   : > { %p4178_p3 = pnand %p4176_p10, %p5928_p9  ;;  %s4182_s24 = scalar_lea.vmem %s4181_s22, 256 }
 0x217   : > { %p4183_p5 = scmp.lt.s32.totalorder %s5071_s16, %s4181_s22  ;;  %p4184_p4 = scmp.lt.s32.totalorder %s4182_s24, %s4175_s11 }
 0x218   : > { %p4179_p7 = pneg %p4178_p3 }
 0x219   : > { %p4185_p0 = por %p4184_p4, %p4183_p5 }
 0x21b   : > { %p4186_p2 = pnand %p4185_p0, %p4179_p7 }
 0x21d   : > { %4189 = shalt.err (!%p4186_p2)
}
 0x21e   : > { %3433 = dma.hbm_to_vmem [thread:$0]  (!%p5926_p12), %s5069_s0, 128, %s5071_s16, %s653_s20  }
 0x21f   : > { %s2925_s19 = sshll.u32 %s689_s15, 6  ;;  %s2926_s29 = sshll.u32 %s4406_s21, 4 }
 0x220   : > { %s2927_s9 = sshll.u32 %s4414_s23, 5  ;;  %s691_s27 = scalar_lea.vmem [#allocation15], %s2925_s19 }
 0x221   : > { %s697_s28 = sadd.s32 %s2927_s9, %s2926_s29  ;;  %s700_s18 = sshll.u32 %s691_s27, 4  ;;  %s5102_s18 = int_to_ptr.vmem [resolvable:$true] %s700_s18 }
 0x222   : > { %s2928_s25 = sshll.u32 %s697_s28, 6  ;;  %s5929_s14 = sld [smem:[#allocation70_spill]] }
 0x223   : > { %p5930_p1 = scmp.ne.s32.totalorder %s5911_s8, 0 }
 0x225   : > { %p4192_p8 = pneg %p5930_p1 }
 0x228   : > { %s5107_s22 = scalar_lea.hbm %s5929_s14, %s2928_s25  ;;  %s4195_s15 = scalar_lea.hbm %s5929_s14, 4096 }
 0x229   : > { %s4190_s0 = scalar_lea.hbm %s5107_s22, 1024  ;;  %p4196_p6 = scmp.lt.u32.totalorder %s5107_s22, %s5929_s14 }
 0x22a   : > { %p4191_p12 = scmp.ne.s32.totalorder %s5107_s22, %s4190_s0  ;;  %p4197_p10 = scmp.lt.u32.totalorder %s4195_s15, %s4190_s0 }
 0x22b   : > { %p4199_p3 = scmp.lt.u32.totalorder %s4190_s0, %s5107_s22 }
 0x22c   : > { %p4193_p11 = pnand %p4192_p8, %p4191_p12  ;;  %p4198_p9 = por %p4197_p10, %p4196_p6 }
 0x22e   : > { %p4194_p13 = pneg %p4193_p11  ;;  %p4200_p7 = por %p4199_p3, %p4198_p9 }
 0x230   : > { %p4201_p5 = pnand %p4200_p7, %p4194_p13 }
 0x232   : > { %4204 = shalt.err (!%p4201_p5)
}
 0x233   : > { %s4205_s19 = scalar_lea.vmem %s5102_s18, 1024  ;;  %s4440_s29 = smov [#allocation15]  }
 0x234   : > { %p4206_p4 = scmp.ne.s32.totalorder %s5102_s18, %s4205_s19  ;;  %s4210_s9 = sshll.u32 %s4440_s29, 4  ;;  %s4211_s9 = int_to_ptr.vmem [resolvable:$false] %s4210_s9 }
 0x235   : > { %s4212_s28 = scalar_lea.vmem %s4211_s9, 2048  ;;  %p4213_p12 = scmp.lt.s32.totalorder %s5102_s18, %s4211_s9 }
 0x236   : > { %p4208_p0 = pnand %p4206_p4, %p4192_p8  ;;  %p4214_p11 = scmp.lt.s32.totalorder %s4212_s28, %s4205_s19 }
 0x238   : > { %p4209_p2 = pneg %p4208_p0  ;;  %p4215_p6 = por %p4214_p11, %p4213_p12 }
 0x23a   : > { %p4216_p10 = pnand %p4215_p6, %p4209_p2 }
 0x23c   : > { %4219 = shalt.err (!%p4216_p10)
}
 0x23d   : > { %s5931_s27 = smov 4   ;;  %s5932_s25 = sld [smem:[#allocation60_spill]] }
 0x23e   : > { %3439 = dma.hbm_to_vmem [thread:$0]  (!%p5930_p1), %s5107_s22, 1024, %s5102_s18, %s4910_s5, %s5884_s6, %s5884_s6, %s5931_s27  }
 0x243   : > { %p5933_p8 = scmp.ne.s32.totalorder %s5932_s25, 0 }
 0x244   : > { %s5934_s11 = sld [smem:[#allocation52_spill]] (!%p5933_p8)  ;;  %s5141_s26 = sand.u32 (!%p5933_p8), 1, %s4386_s30  }
 0x245   : > { %712 = sbr.rel (%p5933_p8) target bundleno = 2805 (0xaf5), region = 88  ;;  %s2930_s0 = sshll.u32 (!%p5933_p8), %s5141_s26, 3 }
 0x246   : > { %s715_s3 = scalar_lea.sflag (!%p5933_p8), [#allocation11], %s5141_s26  ;;  %s5145_s16 = scalar_lea.vmem (!%p5933_p8), [#allocation10], %s2930_s0 }
 0x24a   : > { %p5935_p13 = scmp.ne.s32.totalorder (!%p5933_p8), %s5934_s11, 0 }
 0x24c   : > { %4313 = dma.done.wait (%p5935_p13), %s715_s3, 128  }
 0x24d   : > { %4315 = vsyncadd (%p5935_p13), %s715_s3, 4294967168  ;;  %s723_s6 = sand.u32 1, %s4621_s2   ;;  %s726_s8 = scalar_lea.vmem [#allocation13], %s5141_s26 }
 0x24e   : > { %s724_s5 = scalar_lea.sflag [#allocation14], %s723_s6 }
 0x24f   : > { %4317 = dma.done.wait (%p5935_p13), %s724_s5, 16  }
 0x250   : > { %4319 = vsyncadd (%p5935_p13), %s724_s5, 4294967280  ;;  %s5936_s18 = sld [smem:[#allocation53_spill]]  ;;  %p5937_p1 = scmp.ne.s32.totalorder %s5900_s7, 0 }
 0x256   : > { %s733_s22 = sand.u32 1, %s5936_s18  }
 0x257   : > { %s2931_s15 = sshll.u32 %s733_s22, 6 }
 0x258   : > { %s5158_s20 = scalar_lea.vmem [#allocation15], %s2931_s15 }
 0x259   : > { %4321 = dma.done.wait (%p5937_p1), %s724_s5, 1024  }
 0x25a   : > { %4323 = vsyncadd (%p5937_p1), %s724_s5, 4294966272  ;;  %p5938_p9 = scmp.eq.s32.totalorder %s4621_s2, 0 }
 0x25c   : > { %4325 = dma.done.wait (%p5938_p9), [#allocation17], 272   ;;  %p5939_p3 = pmov %p5938_p9 }
 0x25e   : > { %4327 = vsyncadd (%p5939_p3), [#allocation17], 4294967024  ;;  %p5940_p7 = pmov %p5939_p3 }
 0x25f   : > { %p5941_p5 = pmov %p5939_p3 }
 0x260   : > { %4329 = dma.done.wait (%p5940_p7), [#allocation20], 528  }
 0x261   : > { %4331 = vsyncadd (%p5941_p5), [#allocation20], 4294966768  ;;  %p5942_p4 = pmov %p5939_p3 }
 0x262   : > { %p5943_p0 = pmov %p5939_p3 }
 0x263   : > { %4333 = dma.done.wait (%p5942_p4), [#allocation23], 272  }
 0x264   : > { %4335 = vsyncadd (%p5943_p0), [#allocation23], 4294967024  ;;  %p5944_p2 = pmov %p5943_p0 }
 0x265   : > { %p5945_p12 = pmov %p5943_p0 }
 0x266   : > { %4337 = dma.done.wait (%p5944_p2), [#allocation26], 528  }
 0x267   : > { %4339 = vsyncadd (%p5945_p12), [#allocation26], 4294966768  ;;  %p5946_p11 = pmov %p5943_p0 }
 0x268   : > { %p5947_p6 = pmov %p5943_p0 }
 0x269   : > { %4341 = dma.done.wait (%p5946_p11), [#allocation29], 528  }
 0x26a   : > { %4343 = vsyncadd (%p5947_p6), [#allocation29], 4294966768  ;;  %p5948_p10 = pmov %p5943_p0 }
 0x26b   : > { %p5949_p8 = pmov %p5943_p0 }
 0x26c   : > { %4345 = dma.done.wait (%p5948_p10), [#allocation32], 528  }
 0x26d   : > { %4347 = vsyncadd (%p5949_p8), [#allocation32], 4294966768  ;;  %p5950_p13 = pmov %p5943_p0 }
 0x26e   : > { %p5951_p1 = pmov %p5943_p0 }
 0x26f   : > { %4349 = dma.done.wait (%p5950_p13), [#allocation35], 272  }
 0x270   : > { %4351 = vsyncadd (%p5951_p1), [#allocation35], 4294967024  ;;  %s5952_s7 = sld [smem:[#allocation50_spill]]  ;;  %s5953_s24 = sld [smem:[#allocation57_spill]] }
 0x271   : > { %s5954_s19 = sld [smem:[#allocation56_spill]] }
 0x276   : > { %s848_s29 = sand.u32 1, %s5952_s7   ;;  %p855_p9 = scmp.eq.s32.totalorder %s5953_s24, 0 }
 0x277   : > { %s2946_s9 = sshll.u32 %s848_s29, 7  ;;  %p856_p3 = scmp.eq.s32.totalorder %s5954_s19, 0 }
 0x278   : > { %s5197_s28 = scalar_lea.vmem [#allocation37], %s2946_s9 }
 0x279   : > { %p857_p7 = pnand %p856_p3, %p855_p9 }
 0x27a   : > { %v861_v0 = vld [vmem:[%s5145_s16] sm:$0xff] (!%p857_p7)  ;;  %v862_v1 = vld [vmem:[%s726_s8] sm:$0x1] (!%p857_p7)  ;;  %vm867_vm0 = vcmask (!%p857_p7), 64512   ;;  %v4441_v2 = vmov (!%p857_p7), 0.0   ;;  %vm4442_vm1 = vmmov (!%p857_p7), 0   ;;  %v1184_v34 = vlaneseq (!%p857_p7) }
 0x27b   : > { %860 = sbr.rel (%p857_p7) target bundleno = 1659 (0x67b), region = 160  ;;  %3146 = vmatprep.subr.mxu0 (!%p857_p7), %v4441_v2  ;;  %3148 = vmatprep.mubr.msk.f32.mxu0 (!%p857_p7), %vm4442_vm1, %v4441_v2  ;;  %vm863_vm2 = vcmask (!%p857_p7), 57344   ;;  %v4443_v4 = vmov (!%p857_p7), 0.0|0.0   ;;  %v943_v5 = vld [vmem:[#allocation16] sm:$0xff] (!%p857_p7)  ;;  %v944_v6 = vld [vmem:[#allocation16 + $0x8] sm:$0xff] (!%p857_p7)  ;;  %v1021_v8 = vld [vmem:[#allocation19] sm:$0xff] (!%p857_p7) }
 0x27c   : > { %3147 = vmatpush3.msra.mxu0 (!%p857_p7), %v861_v0  ;;  %v864_v3 = vsel (!%p857_p7), %vm863_vm2, %v862_v1, 0.0  ;;  %3155 = vmatprep.mubr.msk.f32.mxu1 (!%p857_p7), %vm4442_vm1, %v4441_v2  ;;  %v3285_v7 = vpack.c.bf16 (!%p857_p7), %v944_v6, %v943_v5  ;;  %v1022_v9 = vld [vmem:[#allocation19 + $0x8] sm:$0xff] (!%p857_p7)  ;;  %vm946_vm3 = vcmask (!%p857_p7), 130048   ;;  %v1023_v16 = vld [vmem:[#allocation19 + $0x10] sm:$0xff] (!%p857_p7)  ;;  %v1024_v17 = vld [vmem:[#allocation19 + $0x18] sm:$0xff] (!%p857_p7)  ;;  %vm1026_vm4 = vcmask (!%p857_p7), 261120  }
 0x27d   : > { %3149 = vmatmul.mubr.msk.f32.vlgmr.msra.gmra.mrb[0].mxu0 (!%p857_p7), %vm867_vm0, %v862_v1  ;;  %865 = vadd.xlane.f32.xlu0 (!%p857_p7), %v864_v3  ;;  %v3288_v10 = vpack.c.bf16 (!%p857_p7), %v1022_v9, %v1021_v8  ;;  %v3291_v18 = vpack.c.bf16 (!%p857_p7), %v1024_v17, %v1023_v16  ;;  %v1102_v19 = vld [vmem:[#allocation25] sm:$0xff] (!%p857_p7)  ;;  %v1103_v20 = vld [vmem:[#allocation25 + $0x8] sm:$0xff] (!%p857_p7)  ;;  %v1104_v27 = vld [vmem:[#allocation25 + $0x10] sm:$0xff] (!%p857_p7)  ;;  %vm1100_vm5 = vcmask (!%p857_p7), 253952   ;;  %v1185_v35 = vshrl.u32 (!%p857_p7), %v1184_v34, 7 }
 0x27e   : > { %3166 = vmatprep.mubr.msk.f32.mxu0 (!%p857_p7), %vm4442_vm1, %v4441_v2  ;;  %3284 = vmatprep.subr.bf16.mxu1 (!%p857_p7), %v4443_v4  ;;  %v3294_v21 = vpack.c.bf16 (!%p857_p7), %v1103_v20, %v1102_v19  ;;  %v945_v22 = vld [vmem:[#allocation18] sm:$0x1] (!%p857_p7)  ;;  %v1105_v28 = vld [vmem:[#allocation25 + $0x18] sm:$0xff] (!%p857_p7)  ;;  %1248 = vst.msk [vmem:[#allocation9] sm:$0x1] (!%p857_p7), %vm1100_vm5, %v4441_v2  ;;  %v1180_v42 = vld [vmem:[#allocation28] sm:$0xff] (!%p857_p7) }
 0x27f   : > { %3287 = vmatprep.subr.bf16.mxu0 (!%p857_p7), %v4443_v4  ;;  %3286 = vmatpush3.bf16.msra.mxu1 (!%p857_p7), %v3285_v7  ;;  %v3297_v29 = vpack.c.bf16 (!%p857_p7), %v1105_v28, %v1104_v27  ;;  %v1025_v30 = vld [vmem:[#allocation21] sm:$0x1] (!%p857_p7)  ;;  %v1106_v36 = vld [vmem:[#allocation27] sm:$0x1] (!%p857_p7)  ;;  %v1186_v37 = vsub.s32 (!%p857_p7), 0, %v1185_v35  ;;  %v1182_v44 = vld [vmem:[#allocation28 + $0x10] sm:$0xff] (!%p857_p7) }
 0x280   : > { %3293 = vmatprep.subr.bf16.mxu1 (!%p857_p7), %v4443_v4  ;;  %3289 = vmatpush3.bf16.msra.mxu0 (!%p857_p7), %v3288_v10  ;;  %v1181_v41 = vld [vmem:[#allocation28 + $0x8] sm:$0xff] (!%p857_p7)  ;;  %v1183_v45 = vld [vmem:[#allocation28 + $0x18] sm:$0xff] (!%p857_p7)  ;;  %v1233_v0 = vld [vmem:[#allocation30] sm:$0x1] (!%p857_p7)  ;;  %vm1238_vm6 = vcmask (!%p857_p7), 0   ;;  %v4444_v9 = vmov (!%p857_p7), -inf  }
 0x281   : > { %3290 = vmatprep.subr.bf16.mxu0 (!%p857_p7), %v4443_v4  ;;  %v1209_v52 = vld [vmem:[#allocation31] sm:$0xff] (!%p857_p7)  ;;  %v1210_v53 = vld [vmem:[#allocation31 + $0x8] sm:$0xff] (!%p857_p7)  ;;  %v1211_v58 = vld [vmem:[#allocation31 + $0x10] sm:$0xff] (!%p857_p7)  ;;  %1246 = vst.msk [vmem:[#allocation7] sm:$0x1] (!%p857_p7), %vm1238_vm6, %v4444_v9  ;;  %vm1204_vm7 = vcmask (!%p857_p7), 7168  }
 0x282   : > { %v1212_v59 = vld [vmem:[#allocation31 + $0x18] sm:$0xff]  ;;  %v1240_v1 = vld [vmem:[#allocation33] sm:$0x1]  ;;  %1247 = vst.msk [vmem:[#allocation8] sm:$0x1] %vm1238_vm6, %v4441_v2 }
 0x284   : > { %3292 = vmatpush3.bf16.msra.mxu0 %v3291_v18 }
 0x30a   : > { %v866_v11 = vpop.xlane.xlu0 %865 }
 0x30b   : > { %3628 = vrcp.f32 %v866_v11 }
 0x315   : > { %v3629_v12 = vpop.eup %3628 }
 0x350   : > { %v937_v13 = vpop.f32.mrb[0].mxu0 }
 0x351   : > { %v942_v14 = vmul.f32 %v3629_v12, %v937_v13  ;;  %v3150_v15 = vpop.f32.mrb[1].mxu0 }
 0x353   : > { %3156 = vmatmul.mubr.msk.f32.vlgmr.msra.gmra.mrb[0].mxu1 %vm946_vm3, %v942_v14 }
 0x354   : > { %3177 = vmatprep.mubr.msk.f32.mxu1 %vm4442_vm1, %v4441_v2  ;;  %3295 = vmatpush3.bf16.msra.mxu1 %v3294_v21 }
 0x355   : > { %3296 = vmatprep.subr.bf16.mxu1 %v4443_v4 }
 0x358   : > { %3298 = vmatpush3.bf16.msra.mxu1 %v3297_v29 }
 0x426   : > { %v1016_v23 = vpop.f32.mrb[0].mxu1 }
 0x427   : > { %v1017_v24 = vadd.f32 %v1016_v23, %v945_v22  ;;  %v3157_v25 = vpop.f32.mrb[1].mxu1 }
 0x429   : > { %v1020_v26 = vmax.f32 %v1017_v24, 0.0 }
 0x42b   : > { %3167 = vmatmul.mubr.msk.f32.vlgmr.msra.gmra.mrb[2].mxu0 %vm1026_vm4, %v1020_v26 }
 0x4fe   : > { %v1096_v31 = vpop.f32.mrb[2].mxu0 }
 0x4ff   : > { %v1097_v32 = vadd.f32 %v1096_v31, %v1025_v30  ;;  %v3168_v33 = vpop.f32.mrb[3].mxu0 }
 0x501   : > { %1101 = vst.msk [vmem:[#allocation2] sm:$0x1] %vm1100_vm5, %v1097_v32  ;;  %3178 = vmatmul.mubr.msk.f32.vlgmr.msra.gmra.mrb[2].mxu1 %vm1026_vm4, %v1097_v32 }
 0x5d4   : > { %v1176_v38 = vpop.f32.mrb[2].mxu1 }
 0x5d5   : > { %v1177_v39 = vadd.f32 %v1176_v38, %v1106_v36  ;;  %v3179_v40 = vpop.f32.mrb[3].mxu1 }
 0x5d7   : > { %v1187_v43 = vrot.slane %v1177_v39, %v1186_v37  ;;  %v1234_v5 = vmul.f32 %v1233_v0, %v1177_v39  ;;  %v1241_v6 = vmul.f32 %v1240_v1, %v1177_v39 }
 0x5d9   : > { %v1189_v46 = vmul.f32 %v1187_v43, %v1181_v41  ;;  %v1188_v47 = vmul.f32 %v1187_v43, %v1180_v42  ;;  %v1190_v50 = vmul.f32 %v1187_v43, %v1182_v44  ;;  %v1191_v51 = vmul.f32 %v1187_v43, %v1183_v45 }
 0x5da   : > { %v1213_v56 = vmul.f32 %v1209_v52, %v1187_v43  ;;  %v1214_v57 = vmul.f32 %v1210_v53, %v1187_v43  ;;  %v1215_v62 = vmul.f32 %v1211_v58, %v1187_v43  ;;  %v1216_v63 = vmul.f32 %v1212_v59, %v1187_v43 }
 0x5db   : > { %v1195_v48 = vsel %vm1026_vm4, %v1189_v46, 0.0  ;;  %v1192_v49 = vsel %vm1026_vm4, %v1188_v47, 0.0  ;;  %v1198_v54 = vsel %vm1026_vm4, %v1190_v50, 0.0  ;;  %v1201_v55 = vsel %vm1026_vm4, %v1191_v51, 0.0 }
 0x5dc   : > { %1196 = vadd.xlane.f32.xlu1 %v1195_v48  ;;  %1193 = vadd.xlane.f32.xlu0 %v1192_v49  ;;  %v1217_v60 = vsel %vm1026_vm4, %v1213_v56, 0.0  ;;  %v1220_v61 = vsel %vm1026_vm4, %v1214_v57, 0.0  ;;  %v1223_v3 = vsel %vm1026_vm4, %v1215_v62, 0.0  ;;  %v1226_v4 = vsel %vm1026_vm4, %v1216_v63, 0.0 }
 0x5dd   : > { %v1235_v7 = vsel %vm1100_vm5, %v1234_v5, 0.0  ;;  %v1242_v8 = vsel %vm1100_vm5, %v1241_v6, 0.0 }
 0x5e0   : > { %1199 = vadd.xlane.f32.xlu1 %v1198_v54  ;;  %1202 = vadd.xlane.f32.xlu0 %v1201_v55 }
 0x5e4   : > { %1218 = vadd.xlane.f32.xlu1 %v1217_v60  ;;  %1221 = vadd.xlane.f32.xlu0 %v1220_v61 }
 0x5e8   : > { %1224 = vadd.xlane.f32.xlu1 %v1223_v3  ;;  %1227 = vadd.xlane.f32.xlu0 %v1226_v4 }
 0x5ec   : > { %1236 = vadd.xlane.f32.xlu1 %v1235_v7  ;;  %1243 = vadd.xlane.f32.xlu0 %v1242_v8 }
 0x669   : > { %v1197_v10 = vpop.xlane.xlu1 %1196  ;;  %v1194_v11 = vpop.xlane.xlu0 %1193 }
 0x66a   : > { %1206 = vst.msk [vmem:[#allocation3 + $0x8] sm:$0xff] %vm1204_vm7, %v1197_v10  ;;  %1205 = vst.msk [vmem:[#allocation3] sm:$0xff] %vm1204_vm7, %v1194_v11 }
 0x66d   : > { %v1200_v12 = vpop.xlane.xlu1 %1199  ;;  %v1203_v13 = vpop.xlane.xlu0 %1202 }
 0x66e   : > { %1207 = vst.msk [vmem:[#allocation3 + $0x10] sm:$0xff] %vm1204_vm7, %v1200_v12  ;;  %1208 = vst.msk [vmem:[#allocation3 + $0x18] sm:$0xff] %vm1204_vm7, %v1203_v13 }
 0x671   : > { %v1219_v14 = vpop.xlane.xlu1 %1218  ;;  %v1222_v15 = vpop.xlane.xlu0 %1221 }
 0x672   : > { %1229 = vst.msk [vmem:[#allocation4] sm:$0xff] %vm1204_vm7, %v1219_v14  ;;  %1230 = vst.msk [vmem:[#allocation4 + $0x8] sm:$0xff] %vm1204_vm7, %v1222_v15 }
 0x675   : > { %v1225_v2 = vpop.xlane.xlu1 %1224  ;;  %v1228_v16 = vpop.xlane.xlu0 %1227 }
 0x676   : > { %1231 = vst.msk [vmem:[#allocation4 + $0x10] sm:$0xff] %vm1204_vm7, %v1225_v2  ;;  %1232 = vst.msk [vmem:[#allocation4 + $0x18] sm:$0xff] %vm1204_vm7, %v1228_v16 }
 0x679   : > { %v1237_v17 = vpop.xlane.xlu1 %1236  ;;  %v1244_v18 = vpop.xlane.xlu0 %1243 }
 0x67a   : > { %1239 = vst.msk [vmem:[#allocation5] sm:$0x1] %vm1238_vm6, %v1237_v17  ;;  %1245 = vst.msk [vmem:[#allocation6] sm:$0x1] %vm1238_vm6, %v1244_v18 }
 0x67b PF: > { %v3630_v19 = vld [vmem:[#allocation22] sm:$0xff]   ;;  %v3631_v20 = vld [vmem:[#allocation22 + $0x8] sm:$0xff]   ;;  %v2951_v21 = vld [vmem:[#allocation2] ss:$0 sm:$0xff]  ;;  %vm1335_vm8 = vcmask 261120   ;;  %s5955_s2 = sld [smem:[#allocation57_spill]] }
 0x67c   : > { %3180 = vmatprep.subr.bf16.mxu0 %v3630_v19  ;;  %3315 = vmatprep.subr.bf16.mxu1 %v3630_v19  ;;  %v3033_v22 = vld [vmem:[%s5158_s20] sm:$0xff]   ;;  %v3064_v28 = vld [vmem:[%s5158_s20 + $0x8] sm:$0xff]   ;;  %v3065_v34 = vld [vmem:[%s5158_s20 + $0x10] sm:$0xff]  }
 0x67d   : > { %v3067_v23 = vld [vmem:[%s5158_s20 + $0x20] sm:$0xff]   ;;  %3181 = vmatpush3.bf16.msra.mxu0 %v3630_v19  ;;  %3317 = vmatpush3.bf16.msra.mxu1 %v3630_v19  ;;  %v3034_v24 = vunpack.c.l.bf16 %v3033_v22  ;;  %v3035_v25 = vunpack.c.h.bf16 %v3033_v22  ;;  %v3068_v29 = vld [vmem:[%s5158_s20 + $0x28] sm:$0xff]   ;;  %v3038_v30 = vunpack.c.l.bf16 %v3064_v28  ;;  %v3039_v31 = vunpack.c.h.bf16 %v3064_v28  ;;  %v3069_v39 = vld [vmem:[%s5158_s20 + $0x30] sm:$0xff]  }
 0x67e   : > { %v3050_v26 = vunpack.c.l.bf16 %v3067_v23  ;;  %v3051_v27 = vunpack.c.h.bf16 %v3067_v23  ;;  %3182 = vmatprep.subr.bf16.mxu0 %v3631_v20  ;;  %3316 = vmatprep.subr.bf16.mxu1 %v3631_v20  ;;  %v3054_v32 = vunpack.c.l.bf16 %v3068_v29  ;;  %v3055_v33 = vunpack.c.h.bf16 %v3068_v29  ;;  %v3066_v44 = vld [vmem:[%s5158_s20 + $0x18] sm:$0xff]   ;;  %v2952_v7 = vld [vmem:[#allocation24] ss:$0 sm:$0xff] }
 0x67f   : > { %v1288_v35 = vmul.f32 %v3034_v24, %v2951_v21  ;;  %v1289_v36 = vmul.f32 %v3035_v25, %v2951_v21  ;;  %v1290_v40 = vmul.f32 %v3038_v30, %v2951_v21  ;;  %v1291_v41 = vmul.f32 %v3039_v31, %v2951_v21  ;;  %v3070_v49 = vld [vmem:[%s5158_s20 + $0x38] sm:$0xff]  }
 0x680   : > { %v1296_v37 = vmul.f32 %v3050_v26, %v2951_v21  ;;  %v1297_v38 = vmul.f32 %v3051_v27, %v2951_v21  ;;  %v1298_v42 = vmul.f32 %v3054_v32, %v2951_v21  ;;  %v1299_v43 = vmul.f32 %v3055_v33, %v2951_v21 }
 0x681   : > { %3183 = vmatpush3.bf16.msra.mxu0 %v3631_v20  ;;  %3318 = vmatpush3.bf16.msra.mxu1 %v3631_v20  ;;  %v1304_v45 = vpack.c.bf16 %v1289_v36, %v1288_v35  ;;  %v3042_v47 = vunpack.c.l.bf16 %v3065_v34  ;;  %v3043_v48 = vunpack.c.h.bf16 %v3065_v34  ;;  %v1305_v50 = vpack.c.bf16 %v1291_v41, %v1290_v40  ;;  %p2963_p5 = scmp.ne.s32.totalorder %s5955_s2, 0 }
 0x682   : > { %v1308_v46 = vpack.c.bf16 %v1297_v38, %v1296_v37  ;;  %v1309_v51 = vpack.c.bf16 %v1299_v43, %v1298_v42  ;;  %v3058_v52 = vunpack.c.l.bf16 %v3069_v39  ;;  %v3059_v53 = vunpack.c.h.bf16 %v3069_v39 }
 0x683   : > { %3184 = vmatprep.mubr.msk.bf16.mxu0 %vm1335_vm8, %v1304_v45  ;;  %v1292_v54 = vmul.f32 %v3042_v47, %v2951_v21  ;;  %v1293_v55 = vmul.f32 %v3043_v48, %v2951_v21  ;;  %v3046_v56 = vunpack.c.l.bf16 %v3066_v44  ;;  %v3047_v57 = vunpack.c.h.bf16 %v3066_v44 }
 0x684   : > { %3192 = vmatprep.mubr.msk.bf16.mxu1 %vm1335_vm8, %v1308_v46  ;;  %3185 = vmatmul.mubr.msk.bf16.vlgmr.msra.gmra.mrb[0].mxu0 %vm1335_vm8, %v1305_v50  ;;  %v1300_v58 = vmul.f32 %v3058_v52, %v2951_v21  ;;  %v1301_v59 = vmul.f32 %v3059_v53, %v2951_v21  ;;  %v3062_v60 = vunpack.c.l.bf16 %v3070_v49  ;;  %v3063_v61 = vunpack.c.h.bf16 %v3070_v49 }
 0x685   : > { %3193 = vmatmul.mubr.msk.bf16.vlgmr.msra.gmra.mrb[0].mxu1 %vm1335_vm8, %v1309_v51  ;;  %v1306_v62 = vpack.c.bf16 %v1293_v55, %v1292_v54  ;;  %v1294_v63 = vmul.f32 %v3046_v56, %v2951_v21  ;;  %v1295_v0 = vmul.f32 %v3047_v57, %v2951_v21  ;;  %vm1865_vm9 = vcmask (!%p2963_p5), 7168  }
 0x686   : > { %v1310_v1 = vpack.c.bf16 %v1301_v59, %v1300_v58  ;;  %v1302_v3 = vmul.f32 %v3062_v60, %v2951_v21  ;;  %v1303_v4 = vmul.f32 %v3063_v61, %v2951_v21  ;;  %vm2001_vm10 = vcmask (!%p2963_p5), 0  }
 0x687   : > { %3188 = vmatprep.mubr.msk.bf16.mxu0 %vm1335_vm8, %v1306_v62  ;;  %v1307_v5 = vpack.c.bf16 %v1295_v0, %v1294_v63  ;;  %v1644_v63 = vld [vmem:[#allocation3] sm:$0xff] (!%p2963_p5)  ;;  %v1645_v0 = vld [vmem:[#allocation3 + $0x8] sm:$0xff] (!%p2963_p5)  ;;  %vm2148_vm11 = vcmask (!%p2963_p5), 253952  }
 0x688   : > { %3196 = vmatprep.mubr.msk.bf16.mxu1 %vm1335_vm8, %v1310_v1  ;;  %v1311_v6 = vpack.c.bf16 %v1303_v4, %v1302_v3  ;;  %v1646_v1 = vld [vmem:[#allocation3 + $0x10] sm:$0xff] (!%p2963_p5)  ;;  %v3299_v3 = vpack.c.bf16 (!%p2963_p5), %v1645_v0, %v1644_v63  ;;  %v1647_v4 = vld [vmem:[#allocation3 + $0x18] sm:$0xff] (!%p2963_p5) }
 0x68a   : > { %3300 = vmatprep.subr.bf16.mxu1 (!%p2963_p5), %v3299_v3 }
 0x68b   : > { %3302 = vmatpush3.bf16.msra.mxu1 (!%p2963_p5), %v3299_v3 }
 0x68c   : > { %3189 = vmatmul.mubr.msk.bf16.gmra.mrb[4].mxu0 %vm1335_vm8, %v1307_v5  ;;  %v3303_v5 = vpack.c.bf16 (!%p2963_p5), %v1647_v4, %v1646_v1 }
 0x68d   : > { %3197 = vmatmul.mubr.msk.bf16.gmra.mrb[4].mxu1 %vm1335_vm8, %v1311_v6  ;;  %v3634_v6 = vld [vmem:[#allocation34] sm:$0xff] (!%p2963_p5)  }
 0x68e   : > { %3200 = vmatprep.subr.bf16.mxu0 (!%p2963_p5), %v3634_v6  ;;  %3304 = vmatprep.subr.bf16.mxu1 (!%p2963_p5), %v3303_v5 }
 0x68f   : > { %3201 = vmatpush3.bf16.msra.mxu0 (!%p2963_p5), %v3634_v6  ;;  %3306 = vmatpush3.bf16.msra.mxu1 (!%p2963_p5), %v3303_v5 }
 0x757   : > { %v3186_v8 = vpop.f32.mrb[0].mxu0 }
 0x758   : > { %v3194_v9 = vpop.f32.mrb[0].mxu1  ;;  %v1403_v10 = vadd.f32 %v3186_v8, %v2952_v7  ;;  %v1394_v12 = vpop.f32.mrb[1].mxu0  ;;  %v4445_v8 = vmov (!%p2963_p5), 0  }
 0x759   : > { %v1435_v11 = vadd.f32 %v3194_v9, %v2952_v7  ;;  %v1426_v13 = vpop.f32.mrb[1].mxu1  ;;  %v1395_v14 = vadd.f32 %v2952_v7, %v1394_v12  ;;  %v3187_v2 = vpop.f32.mrb[2].mxu0  ;;  %3633 = vset.pattern.permute.xlu1 (!%p2963_p5), %v4445_v8  ;;  %3632 = vset.pattern.permute.xlu0 (!%p2963_p5), %v4445_v8 }
 0x75a   : > { %v1427_v15 = vadd.f32 %v2952_v7, %v1426_v13  ;;  %v3195_v16 = vpop.f32.mrb[2].mxu1  ;;  %v1406_v17 = vadd.f32 %v3187_v2, %v2952_v7  ;;  %v1397_v19 = vpop.f32.mrb[3].mxu0  ;;  %v5255_v23 = vmax.f32 %v1403_v10, 0.0  ;;  %v5347_v10 = vld [vmem:[#allocation5] ss:$0 sm:$0xff] (!%p2963_p5) }
 0x75b   : > { %v1438_v18 = vadd.f32 %v3195_v16, %v2952_v7  ;;  %v1429_v20 = vpop.f32.mrb[3].mxu1  ;;  %v1398_v21 = vadd.f32 %v2952_v7, %v1397_v19  ;;  %v5257_v24 = vmax.f32 %v1435_v11, 0.0  ;;  %v5263_v27 = vmax.f32 %v1395_v14, 0.0 }
 0x75c   : > { %v1430_v22 = vadd.f32 %v2952_v7, %v1429_v20  ;;  %v5259_v25 = vmax.f32 %v1406_v17, 0.0  ;;  %v5265_v28 = vmax.f32 %v1427_v15, 0.0 }
 0x75d   : > { %v5261_v26 = vmax.f32 %v1438_v18, 0.0  ;;  %v5267_v29 = vmax.f32 %v1398_v21, 0.0  ;;  %3228 = vmatprep.mubr.msk.f32.mxu1 (!%p2963_p5), %vm1335_vm8, %v5263_v27 }
 0x75e   : > { %v5269_v30 = vmax.f32 %v1430_v22, 0.0  ;;  %v1474_v31 = vpack.c.bf16 %v5259_v25, %v5255_v23 }
 0x75f   : > { %v1478_v32 = vpack.c.bf16 %v5261_v26, %v5257_v24  ;;  %v1473_v33 = vpack.c.bf16 %v5267_v29, %v5263_v27  ;;  %v3190_v35 = vpop.f32.mrb[4].mxu0  ;;  %3229 = vmatmul.mubr.msk.f32.vlgmr.msra.gmra.mrb[0].mxu1 (!%p2963_p5), %vm1335_vm8, %v5267_v29 }
 0x760   : > { %v1477_v34 = vpack.c.bf16 %v5269_v30, %v5265_v28  ;;  %v3198_v36 = vpop.f32.mrb[4].mxu1  ;;  %v1419_v37 = vadd.f32 %v3190_v35, %v2952_v7  ;;  %v1410_v39 = vpop.f32.mrb[5].mxu0  ;;  %3231 = vmatprep.mubr.msk.f32.mxu1 (!%p2963_p5), %vm1335_vm8, %v5255_v23 }
 0x761   : > { %v1451_v38 = vadd.f32 %v3198_v36, %v2952_v7  ;;  %v1442_v40 = vpop.f32.mrb[5].mxu1  ;;  %v1411_v41 = vadd.f32 %v2952_v7, %v1410_v39  ;;  %v3191_v43 = vpop.f32.mrb[6].mxu0  ;;  %3204 = vmatprep.mubr.msk.bf16.mxu0 (!%p2963_p5), %vm1335_vm8, %v1473_v33 }
 0x762   : > { %v1443_v42 = vadd.f32 %v2952_v7, %v1442_v40  ;;  %v3199_v44 = vpop.f32.mrb[6].mxu1  ;;  %v1422_v45 = vadd.f32 %v3191_v43, %v2952_v7  ;;  %v1413_v47 = vpop.f32.mrb[7].mxu0  ;;  %v5279_v51 = vmax.f32 %v1419_v37, 0.0  ;;  %1499 = sbr.rel (%p2963_p5) target bundleno = 2352 (0x930), region = 164 }
 0x763   : > { %v1454_v46 = vadd.f32 %v3199_v44, %v2952_v7  ;;  %v1445_v48 = vpop.f32.mrb[7].mxu1  ;;  %v1414_v49 = vadd.f32 %v2952_v7, %v1413_v47  ;;  %v5281_v52 = vmax.f32 %v1451_v38, 0.0  ;;  %v5287_v55 = vmax.f32 %v1411_v41, 0.0  ;;  %3232 = vmatmul.mubr.msk.f32.gmra.mrb[2].mxu1 (!%p2963_p5), %vm1335_vm8, %v5259_v25 }
 0x764   : > { %v1446_v50 = vadd.f32 %v2952_v7, %v1445_v48  ;;  %v5283_v53 = vmax.f32 %v1422_v45, 0.0  ;;  %v5289_v56 = vmax.f32 %v1443_v42, 0.0  ;;  %v3635_v7 = vld [vmem:[#allocation34 + $0x8] sm:$0xff] (!%p2963_p5)  }
 0x765   : > { %v5285_v54 = vmax.f32 %v1454_v46, 0.0  ;;  %v5291_v57 = vmax.f32 %v1414_v49, 0.0  ;;  %3202 = vmatprep.subr.bf16.mxu0 (!%p2963_p5), %v3635_v7  ;;  %3234 = vmatprep.mubr.msk.f32.mxu1 (!%p2963_p5), %vm1335_vm8, %v5287_v55 }
 0x766   : > { %v5293_v58 = vmax.f32 %v1446_v50, 0.0  ;;  %v1476_v59 = vpack.c.bf16 %v5283_v53, %v5279_v51  ;;  %3203 = vmatpush3.bf16.msra.mxu0 (!%p2963_p5), %v3635_v7 }
 0x767   : > { %v1480_v60 = vpack.c.bf16 %v5285_v54, %v5281_v52  ;;  %v1475_v61 = vpack.c.bf16 %v5291_v57, %v5287_v55  ;;  %3235 = vmatmul.mubr.msk.f32.gmra.mrb[4].mxu1 (!%p2963_p5), %vm1335_vm8, %v5291_v57 }
 0x768   : > { %v1479_v62 = vpack.c.bf16 %v5293_v58, %v5289_v56  ;;  %3237 = vmatprep.mubr.msk.f32.mxu1 (!%p2963_p5), %vm1335_vm8, %v5279_v51 }
 0x769   : > { %3205 = vmatmul.mubr.msk.bf16.vlgmr.msra.gmra.mrb[0].mxu0 %vm1335_vm8, %v1474_v31 }
 0x76a   : > { %3208 = vmatprep.mubr.msk.bf16.mxu0 %vm1335_vm8, %v1475_v61 }
 0x76b   : > { %3238 = vmatmul.mubr.msk.f32.gmra.mrb[6].mxu1 %vm1335_vm8, %v5283_v53 }
 0x76c   : > { %3240 = vmatprep.mubr.msk.f32.mxu1 %vm1335_vm8, %v5265_v28 }
 0x76f   : > { %3241 = vmatmul.mubr.msk.f32.gmra.mrb[8].mxu1 %vm1335_vm8, %v5269_v30 }
 0x770   : > { %3243 = vmatprep.mubr.msk.f32.mxu1 %vm1335_vm8, %v5257_v24 }
 0x771   : > { %3209 = vmatmul.mubr.msk.bf16.gmra.mrb[4].mxu0 %vm1335_vm8, %v1476_v59 }
 0x772   : > { %3212 = vmatprep.mubr.msk.bf16.mxu0 %vm1335_vm8, %v1477_v34 }
 0x773   : > { %3244 = vmatmul.mubr.msk.f32.gmra.mrb[10].mxu1 %vm1335_vm8, %v5261_v26 }
 0x774   : > { %3246 = vmatprep.mubr.msk.f32.mxu1 %vm1335_vm8, %v5289_v56 }
 0x777   : > { %3247 = vmatmul.mubr.msk.f32.gmra.mrb[12].mxu1 %vm1335_vm8, %v5293_v58 }
 0x778   : > { %3249 = vmatprep.mubr.msk.f32.mxu1 %vm1335_vm8, %v5281_v52 }
 0x779   : > { %3213 = vmatmul.mubr.msk.bf16.gmra.mrb[8].mxu0 %vm1335_vm8, %v1478_v32 }
 0x77a   : > { %3216 = vmatprep.mubr.msk.bf16.mxu0 %vm1335_vm8, %v1479_v62 }
 0x77b   : > { %3250 = vmatmul.mubr.msk.f32.gmra.mrb[14].mxu1 %vm1335_vm8, %v5285_v54 }
 0x781   : > { %3217 = vmatmul.mubr.msk.bf16.gmra.mrb[12].mxu0 %vm1335_vm8, %v1480_v60 }
 0x832   : > { %v3230_v9 = vpop.f32.mrb[0].mxu1 }
 0x833   : > { %v1769_v11 = vpop.f32.mrb[1].mxu1  ;;  %v1775_v15 = vadd.f32 %v3230_v9, %v5347_v10 }
 0x834   : > { %v1770_v17 = vadd.f32 %v5347_v10, %v1769_v11 }
 0x835   : > { %v5359_v19 = vmul.f32 0.17677669, %v1775_v15 }
 0x836   : > { %v3233_v2 = vpop.f32.mrb[2].mxu1  ;;  %v5361_v21 = vmul.f32 0.17677669, %v1770_v17 }
 0x837   : > { %v1779_v18 = vpop.f32.mrb[3].mxu1  ;;  %v1785_v22 = vadd.f32 %v3233_v2, %v5347_v10  ;;  %v1867_v36 = vsel %vm1865_vm9, %v5359_v19, -inf }
 0x838   : > { %v1780_v33 = vadd.f32 %v5347_v10, %v1779_v18  ;;  %v1866_v39 = vsel %vm1865_vm9, %v5361_v21, -inf }
 0x839   : > { %v5375_v40 = vmul.f32 0.17677669, %v1785_v22 }
 0x83a   : > { %v3236_v20 = vpop.f32.mrb[4].mxu1  ;;  %v5380_v44 = vmul.f32 0.17677669, %v1780_v33 }
 0x83b   : > { %v1795_v31 = vadd.f32 %v3236_v20, %v5347_v10  ;;  %v1789_v32 = vpop.f32.mrb[5].mxu1  ;;  %v1869_v60 = vsel %vm1865_vm9, %v5375_v40, -inf }
 0x83c   : > { %v5349_v12 = vpop.f32.mrb[0].mxu0  ;;  %v1790_v34 = vadd.f32 %v5347_v10, %v1789_v32  ;;  %v1868_v0 = vsel %vm1865_vm9, %v5380_v44, -inf }
 0x83d   : > { %v5351_v13 = vpop.f32.mrb[1].mxu0  ;;  %v5367_v35 = vmul.f32 0.17677669, %v1795_v31 }
 0x83e   : > { %v5353_v14 = vpop.f32.mrb[2].mxu0  ;;  %v5371_v37 = vmul.f32 0.17677669, %v1790_v34  ;;  %v3239_v38 = vpop.f32.mrb[6].mxu1 }
 0x83f   : > { %v5356_v16 = vpop.f32.mrb[3].mxu0  ;;  %v1872_v41 = vsel %vm1865_vm9, %v5367_v35, -inf  ;;  %v1805_v42 = vadd.f32 %v3239_v38, %v5347_v10  ;;  %v1799_v43 = vpop.f32.mrb[7].mxu1 }
 0x840   : > { %v1873_v45 = vmax.f32 %v1867_v36, %v1872_v41  ;;  %v1870_v46 = vsel %vm1865_vm9, %v5371_v37, -inf  ;;  %v1800_v47 = vadd.f32 %v5347_v10, %v1799_v43 }
 0x841   : > { %v1871_v48 = vmax.f32 %v1866_v39, %v1870_v46  ;;  %v5385_v49 = vmul.f32 0.17677669, %v1805_v42 }
 0x842   : > { %v5387_v50 = vmul.f32 0.17677669, %v1800_v47  ;;  %v3242_v59 = vpop.f32.mrb[8].mxu1 }
 0x843   : > { %v1876_v61 = vsel %vm1865_vm9, %v5385_v49, -inf  ;;  %v1815_v62 = vadd.f32 %v3242_v59, %v5347_v10  ;;  %v1809_v63 = vpop.f32.mrb[9].mxu1 }
 0x844   : > { %v1877_v1 = vmax.f32 %v1869_v60, %v1876_v61  ;;  %v1874_v3 = vsel %vm1865_vm9, %v5387_v50, -inf  ;;  %v1810_v4 = vadd.f32 %v5347_v10, %v1809_v63 }
 0x845   : > { %v1875_v5 = vmax.f32 %v1868_v0, %v1874_v3  ;;  %v5399_v6 = vmul.f32 0.17677669, %v1815_v62 }
 0x846   : > { %v5401_v7 = vmul.f32 0.17677669, %v1810_v4  ;;  %v3245_v8 = vpop.f32.mrb[10].mxu1 }
 0x847   : > { %v1880_v9 = vsel %vm1865_vm9, %v5399_v6, -inf  ;;  %v1825_v11 = vadd.f32 %v3245_v8, %v5347_v10  ;;  %v1819_v15 = vpop.f32.mrb[11].mxu1 }
 0x848   : > { %v1881_v2 = vmax.f32 %v1873_v45, %v1880_v9  ;;  %v1878_v17 = vsel %vm1865_vm9, %v5401_v7, -inf  ;;  %v1820_v18 = vadd.f32 %v5347_v10, %v1819_v15 }
 0x849   : > { %v1879_v20 = vmax.f32 %v1871_v48, %v1878_v17  ;;  %v5409_v22 = vmul.f32 0.17677669, %v1825_v11 }
 0x84a   : > { %v5411_v31 = vmul.f32 0.17677669, %v1820_v18  ;;  %v3248_v32 = vpop.f32.mrb[12].mxu1  ;;  %v1908_v18 = vlaneseq }
 0x84b   : > { %v1884_v33 = vsel %vm1865_vm9, %v5409_v22, -inf  ;;  %v1835_v34 = vadd.f32 %v3248_v32, %v5347_v10  ;;  %v1829_v36 = vpop.f32.mrb[13].mxu1 }
 0x84c   : > { %v1885_v38 = vmax.f32 %v1877_v1, %v1884_v33  ;;  %v1882_v39 = vsel %vm1865_vm9, %v5411_v31, -inf  ;;  %v1830_v41 = vadd.f32 %v5347_v10, %v1829_v36  ;;  %v5437_v32 = vshrl.u32 %v1908_v18, 7 }
 0x84d   : > { %v1883_v42 = vmax.f32 %v1875_v5, %v1882_v39  ;;  %v5419_v43 = vmul.f32 0.17677669, %v1835_v34  ;;  %v5439_v34 = vld [vmem:[#allocation7] sm:$0x1] }
 0x84e   : > { %v5421_v45 = vmul.f32 0.17677669, %v1830_v41  ;;  %v3251_v46 = vpop.f32.mrb[14].mxu1  ;;  %v1910_v39 = vsub.s32 0, %v5437_v32 }
 0x84f   : > { %v1888_v47 = vsel %vm1865_vm9, %v5419_v43, -inf  ;;  %v1845_v48 = vadd.f32 %v3251_v46, %v5347_v10  ;;  %v1839_v59 = vpop.f32.mrb[15].mxu1 }
 0x850   : > { %v1889_v60 = vmax.f32 %v1881_v2, %v1888_v47  ;;  %v1886_v61 = vsel %vm1865_vm9, %v5421_v45, -inf  ;;  %v1840_v62 = vadd.f32 %v5347_v10, %v1839_v59 }
 0x851   : > { %v1887_v63 = vmax.f32 %v1879_v20, %v1886_v61  ;;  %v5429_v0 = vmul.f32 0.17677669, %v1845_v48 }
 0x852   : > { %v5431_v1 = vmul.f32 0.17677669, %v1840_v62 }
 0x853   : > { %v1894_v3 = vmax.f32 %v1887_v63, %v1889_v60  ;;  %v1892_v4 = vsel %vm1865_vm9, %v5429_v0, -inf }
 0x854   : > { %v1893_v5 = vmax.f32 %v1885_v38, %v1892_v4  ;;  %v1890_v8 = vsel %vm1865_vm9, %v5431_v1, -inf }
 0x855   : > { %v1891_v9 = vmax.f32 %v1883_v42, %v1890_v8 }
 0x857   : > { %v1895_v11 = vmax.f32 %v1891_v9, %v1893_v5 }
 0x859   : > { %v1896_v15 = vmax.f32 %v1894_v3, %v1895_v11 }
 0x85b   : > { %v1897_v2 = vrot.slane %v1896_v15, 4 }
 0x85d   : > { %v1898_v17 = vmax.f32 %v1896_v15, %v1897_v2 }
 0x85f   : > { %v1899_v10 = vrot.slane %v1898_v17, 2 }
 0x861   : > { %v1900_v20 = vmax.f32 %v1898_v17, %v1899_v10  ;;  %v5486_v10 = vpop.f32.mrb[4].mxu0 }
 0x863   : > { %v1901_v33 = vrot.slane %v1900_v20, 1 }
 0x865   : > { %v1902_v36 = vmax.f32 %v1900_v20, %v1901_v33 }
 0x867   : > { %v5443_v38 = vmax.f32 %v5439_v34, %v1902_v36 }
 0x869   : > { %v5448_v41 = vrot.slane %v5443_v38, %v1910_v39  ;;  %2150 = vst.msk [vmem:[#allocation7] sm:$0x1] %vm2001_vm10, %v5443_v38 }
 0x86b   : > { %v1927_v42 = vsub.f32 %v5431_v1, %v5448_v41  ;;  %v1915_v46 = vsub.f32 %v5380_v44, %v5448_v41  ;;  %v1913_v47 = vsub.f32 %v5361_v21, %v5448_v41  ;;  %v1914_v48 = vsub.f32 %v5359_v19, %v5448_v41 }
 0x86c   : > { %v1916_v59 = vsub.f32 %v5375_v40, %v5448_v41  ;;  %v1917_v60 = vsub.f32 %v5371_v37, %v5448_v41  ;;  %v1918_v61 = vsub.f32 %v5367_v35, %v5448_v41  ;;  %v1919_v63 = vsub.f32 %v5387_v50, %v5448_v41 }
 0x86d   : > { %v1933_v62 = vmul.f32 1.442695, %v1915_v46  ;;  %v1920_v44 = vsub.f32 %v5385_v49, %v5448_v41  ;;  %v1921_v21 = vsub.f32 %v5401_v7, %v5448_v41  ;;  %v1922_v19 = vsub.f32 %v5399_v6, %v5448_v41 }
 0x86e   : > { %v1923_v40 = vsub.f32 %v5411_v31, %v5448_v41  ;;  %v1924_v37 = vsub.f32 %v5409_v22, %v5448_v41  ;;  %v1925_v35 = vsub.f32 %v5421_v45, %v5448_v41  ;;  %v1926_v50 = vsub.f32 %v5419_v43, %v5448_v41 }
 0x86f   : > { %3636 = vpow2.f32 %v1933_v62  ;;  %v1928_v49 = vsub.f32 %v5429_v0, %v5448_v41  ;;  %v1929_v7 = vmul.f32 1.442695, %v1913_v47  ;;  %v1931_v3 = vmul.f32 1.442695, %v1914_v48 }
 0x870   : > { %v1935_v4 = vmul.f32 1.442695, %v1916_v59  ;;  %v1937_v6 = vmul.f32 1.442695, %v1917_v60  ;;  %v1939_v31 = vmul.f32 1.442695, %v1918_v61 }
 0x871   : > { %3638 = vpow2.f32 %v1929_v7  ;;  %v1941_v22 = vmul.f32 1.442695, %v1919_v63  ;;  %v1943_v5 = vmul.f32 1.442695, %v1920_v44  ;;  %v1945_v43 = vmul.f32 1.442695, %v1921_v21 }
 0x872   : > { %3640 = vpow2.f32 %v1931_v3  ;;  %v1947_v9 = vmul.f32 1.442695, %v1922_v19  ;;  %v1949_v17 = vmul.f32 1.442695, %v1923_v40  ;;  %v1951_v33 = vmul.f32 1.442695, %v1924_v37 }
 0x873   : > { %3642 = vpow2.f32 %v1935_v4  ;;  %v1953_v59 = vmul.f32 1.442695, %v1925_v35  ;;  %v1955_v61 = vmul.f32 1.442695, %v1926_v50  ;;  %v5492_v40 = vpop.f32.mrb[5].mxu0 }
 0x874   : > { %3644 = vpow2.f32 %v1937_v6  ;;  %v1957_v37 = vmul.f32 1.442695, %v1927_v42  ;;  %v5497_v7 = vpop.f32.mrb[6].mxu0  ;;  %v1959_v50 = vmul.f32 1.442695, %v1928_v49 }
 0x875   : > { %3646 = vpow2.f32 %v1939_v31  ;;  %v5500_v4 = vpop.f32.mrb[7].mxu0 }
 0x876   : > { %3648 = vpow2.f32 %v1941_v22  ;;  %v5505_v41 = vpop.f32.mrb[8].mxu0 }
 0x877   : > { %3650 = vpow2.f32 %v1943_v5  ;;  %v1904_v5 = vsub.f32 %v5439_v34, %v5443_v38 }
 0x878   : > { %3652 = vpow2.f32 %v1945_v43 }
 0x879   : > { %v3637_v45 = vpop.eup %3636  ;;  %3654 = vpow2.f32 %v1947_v9  ;;  %v1905_v9 = vmul.f32 1.442695, %v1904_v5 }
 0x87a   : > { %2026 = vperm.xlu1 %3633, %v3637_v45   ;;  %v1966_v20 = vsel %vm1865_vm9, %v3637_v45, 0.0  ;;  %3656 = vpow2.f32 %v1949_v17 }
 0x87b   : > { %v3639_v8 = vpop.eup %3638  ;;  %3658 = vpow2.f32 %v1951_v33 }
 0x87c   : > { %v3641_v0 = vpop.eup %3640  ;;  %2016 = vperm.xlu0 %3632, %v3639_v8   ;;  %v1963_v11 = vsel %vm1865_vm9, %v3639_v8, 0.0  ;;  %3660 = vpow2.f32 %v1953_v59 }
 0x87d   : > { %v3643_v15 = vpop.eup %3642  ;;  %v1964_v2 = vsel %vm1865_vm9, %v3641_v0, 0.0  ;;  %3662 = vpow2.f32 %v1955_v61 }
 0x87e   : > { %v1965_v18 = vadd.f32 %v1964_v2, %v1963_v11  ;;  %2031 = vperm.xlu1 %3633, %v3643_v15   ;;  %v3645_v36 = vpop.eup %3644  ;;  %v1968_v48 = vsel %vm1865_vm9, %v3643_v15, 0.0  ;;  %3664 = vpow2.f32 %v1957_v37  ;;  %v5509_v11 = vpop.f32.mrb[9].mxu0 }
 0x87f   : > { %v3647_v47 = vpop.eup %3646  ;;  %v1970_v62 = vsel %vm1865_vm9, %v3645_v36, 0.0  ;;  %3666 = vpow2.f32 %v1959_v50  ;;  %v5511_v38 = vpop.f32.mrb[10].mxu0 }
 0x880   : > { %v1967_v46 = vadd.f32 %v1966_v20, %v1965_v18  ;;  %2021 = vperm.xlu0 %3632, %v3641_v0   ;;  %v3649_v63 = vpop.eup %3648  ;;  %v1972_v19 = vsel %vm1865_vm9, %v3647_v47, 0.0  ;;  %v5514_v2 = vpop.f32.mrb[11].mxu0  ;;  %3668 = vpow2.f32 %v1905_v9 }
 0x881   : > { %v3651_v21 = vpop.eup %3650  ;;  %v1974_v3 = vsel %vm1865_vm9, %v3649_v63, 0.0 }
 0x882   : > { %v1969_v60 = vadd.f32 %v1968_v48, %v1967_v46  ;;  %2041 = vperm.xlu1 %3633, %v3647_v47   ;;  %v3653_v6 = vpop.eup %3652  ;;  %v1976_v1 = vsel %vm1865_vm9, %v3651_v21, 0.0 }
 0x883   : > { %v3655_v22 = vpop.eup %3654  ;;  %v1978_v49 = vsel %vm1865_vm9, %v3653_v6, 0.0 }
 0x884   : > { %v1971_v44 = vadd.f32 %v1970_v62, %v1969_v60  ;;  %2036 = vperm.xlu0 %3632, %v3645_v36   ;;  %v3657_v45 = vpop.eup %3656  ;;  %v1980_v0 = vsel %vm1865_vm9, %v3655_v22, 0.0  ;;  %v5517_v36 = vpop.f32.mrb[12].mxu0 }
 0x885   : > { %v3659_v8 = vpop.eup %3658  ;;  %v1982_v15 = vsel %vm1865_vm9, %v3657_v45, 0.0  ;;  %v5521_v62 = vpop.f32.mrb[13].mxu0 }
 0x886   : > { %v1973_v35 = vadd.f32 %v1972_v19, %v1971_v44  ;;  %2051 = vperm.xlu1 %3633, %v3651_v21   ;;  %v3661_v17 = vpop.eup %3660  ;;  %v1984_v33 = vsel %vm1865_vm9, %v3659_v8, 0.0  ;;  %v5523_v44 = vpop.f32.mrb[14].mxu0 }
 0x887   : > { %v3663_v20 = vpop.eup %3662  ;;  %v1986_v47 = vsel %vm1865_vm9, %v3661_v17, 0.0  ;;  %v5526_v19 = vpop.f32.mrb[15].mxu0 }
 0x888   : > { %v1975_v31 = vadd.f32 %v1974_v3, %v1973_v35  ;;  %2046 = vperm.xlu0 %3632, %v3649_v63   ;;  %v3665_v48 = vpop.eup %3664  ;;  %v1988_v61 = vsel %vm1865_vm9, %v3663_v20, 0.0 }
 0x889   : > { %v3667_v60 = vpop.eup %3666  ;;  %v1990_v21 = vsel %vm1865_vm9, %v3665_v48, 0.0 }
 0x88a   : > { %v1977_v42 = vadd.f32 %v1976_v1, %v1975_v31  ;;  %2061 = vperm.xlu1 %3633, %v3655_v22   ;;  %v1992_v35 = vsel %vm1865_vm9, %v3667_v60, 0.0  ;;  %v3669_v3 = vpop.eup %3668  ;;  %v1961_v1 = vld [vmem:[#allocation8] sm:$0x1] }
 0x88c   : > { %v1979_v43 = vadd.f32 %v1978_v49, %v1977_v42  ;;  %2056 = vperm.xlu0 %3632, %v3653_v6   ;;  %v1962_v49 = vmul.f32 %v3669_v3, %v1961_v1 }
 0x88e   : > { %v1981_v34 = vadd.f32 %v1980_v0, %v1979_v43  ;;  %2071 = vperm.xlu1 %3633, %v3659_v8   ;;  %v5530_v8 = vld [vmem:[#allocation36] ss:$0 sm:$0xff] }
 0x88f   : > { %v1582_v0 = vadd.f32 %v5530_v8, %v5351_v13 }
 0x890   : > { %v1983_v18 = vadd.f32 %v1982_v15, %v1981_v34  ;;  %2066 = vperm.xlu0 %3632, %v3657_v45   ;;  %v1590_v15 = vadd.f32 %v5349_v12, %v5530_v8 }
 0x892   : > { %v1985_v46 = vadd.f32 %v1984_v33, %v1983_v18  ;;  %2081 = vperm.xlu1 %3633, %v3663_v20   ;;  %v1585_v18 = vadd.f32 %v5530_v8, %v5356_v16 }
 0x894   : > { %v1987_v59 = vadd.f32 %v1986_v47, %v1985_v46  ;;  %2076 = vperm.xlu0 %3632, %v3661_v17   ;;  %v1593_v46 = vadd.f32 %v5353_v14, %v5530_v8 }
 0x896   : > { %v1989_v63 = vadd.f32 %v1988_v61, %v1987_v59  ;;  %2091 = vperm.xlu1 %3633, %v3667_v60   ;;  %v1598_v59 = vadd.f32 %v5530_v8, %v5492_v40 }
 0x898   : > { %v1991_v37 = vadd.f32 %v1990_v21, %v1989_v63  ;;  %2086 = vperm.xlu0 %3632, %v3665_v48   ;;  %v1601_v63 = vadd.f32 %v5530_v8, %v5500_v4 }
 0x89a   : > { %v1993_v50 = vadd.f32 %v1992_v35, %v1991_v37 }
 0x89c   : > { %v1994_v6 = vrot.slane %v1993_v50, 4  ;;  %2006 = vperm.xlu0 %3632, %v3669_v3   ;;  %v1606_v3 = vadd.f32 %v5486_v10, %v5530_v8  ;;  %v1617_v10 = vadd.f32 %v5530_v8, %v5514_v2 }
 0x89e   : > { %v1995_v31 = vadd.f32 %v1994_v6, %v1993_v50 }
 0x8a0   : > { %v1996_v22 = vrot.slane %v1995_v31, 2 }
 0x8a2   : > { %v1997_v5 = vadd.f32 %v1996_v22, %v1995_v31 }
 0x8a4   : > { %v1998_v42 = vrot.slane %v1997_v5, 1 }
 0x8a6   : > { %v1999_v45 = vadd.f32 %v1998_v42, %v1997_v5  ;;  %v1609_v5 = vadd.f32 %v5497_v7, %v5530_v8  ;;  %v1614_v42 = vadd.f32 %v5530_v8, %v5509_v11 }
 0x8a8   : > { %v2000_v43 = vadd.f32 %v1999_v45, %v1962_v49 }
 0x8aa   : > { %2002 = vst.msk [vmem:[#allocation8] sm:$0x1] %vm2001_vm10, %v2000_v43 }
 0x8f9   : > { %v2027_v9 = vpop.permute.xlu1 %2026 }
 0x8fa   : > { %v2096_v47 = vmul.f32 %v2027_v9, %v1590_v15 }
 0x8fb   : > { %v2017_v34 = vpop.permute.xlu0 %2016 }
 0x8fc   : > { %v2094_v20 = vmul.f32 %v2017_v34, %v1582_v0  ;;  %v2113_v37 = vsel %vm1335_vm8, %v2096_v47, 0.0 }
 0x8fd   : > { %v2032_v17 = vpop.permute.xlu1 %2031 }
 0x8fe   : > { %v2110_v13 = vsel %vm1335_vm8, %v2094_v20, 0.0  ;;  %v2097_v61 = vmul.f32 %v2032_v17, %v1593_v46  ;;  %v1622_v20 = vadd.f32 %v5505_v41, %v5530_v8  ;;  %v1633_v41 = vadd.f32 %v5530_v8, %v5526_v19 }
 0x8ff   : > { %v2022_v33 = vpop.permute.xlu0 %2021 }
 0x900   : > { %v2095_v48 = vmul.f32 %v2022_v33, %v1585_v18  ;;  %v2115_v40 = vsel %vm1335_vm8, %v2097_v61, 0.0 }
 0x901   : > { %v2042_v60 = vpop.permute.xlu1 %2041 }
 0x902   : > { %v2111_v12 = vsel %vm1335_vm8, %v2095_v48, 0.0  ;;  %v2099_v6 = vmul.f32 %v2042_v60, %v1601_v63  ;;  %v1625_v48 = vadd.f32 %v5511_v38, %v5530_v8  ;;  %v1630_v60 = vadd.f32 %v5530_v8, %v5521_v62 }
 0x903   : > { %v2112_v16 = vadd.f32 %v2111_v12, %v2110_v13  ;;  %v2037_v21 = vpop.permute.xlu0 %2036 }
 0x904   : > { %v2098_v35 = vmul.f32 %v2037_v21, %v1598_v59  ;;  %v2119_v43 = vsel %vm1335_vm8, %v2099_v6, 0.0 }
 0x905   : > { %v2114_v14 = vadd.f32 %v2113_v37, %v2112_v16  ;;  %v2052_v50 = vpop.permute.xlu1 %2051 }
 0x906   : > { %v2117_v4 = vsel %vm1335_vm8, %v2098_v35, 0.0  ;;  %v2101_v9 = vmul.f32 %v2052_v50, %v1609_v5 }
 0x907   : > { %v2116_v31 = vadd.f32 %v2115_v40, %v2114_v14  ;;  %v2047_v22 = vpop.permute.xlu0 %2046  ;;  %v1638_v14 = vadd.f32 %v5517_v36, %v5530_v8 }
 0x908   : > { %v2100_v1 = vmul.f32 %v2047_v22, %v1606_v3  ;;  %v2123_v11 = vsel %vm1335_vm8, %v2101_v9, 0.0 }
 0x909   : > { %v2118_v49 = vadd.f32 %v2117_v4, %v2116_v31  ;;  %v2062_v45 = vpop.permute.xlu1 %2061  ;;  %v1641_v31 = vadd.f32 %v5523_v44, %v5530_v8  ;;  %v2003_v8 = vld [vmem:[#allocation9] sm:$0x1] }
 0x90a   : > { %v2121_v15 = vsel %vm1335_vm8, %v2100_v1, 0.0  ;;  %v2103_v33 = vmul.f32 %v2062_v45, %v1617_v10 }
 0x90b   : > { %v2120_v0 = vadd.f32 %v2119_v43, %v2118_v49  ;;  %v2057_v34 = vpop.permute.xlu0 %2056 }
 0x90c   : > { %v2102_v17 = vmul.f32 %v2057_v34, %v1614_v42  ;;  %v2127_v12 = vsel %vm1335_vm8, %v2103_v33, 0.0 }
 0x90d   : > { %v2122_v7 = vadd.f32 %v2121_v15, %v2120_v0  ;;  %v2072_v18 = vpop.permute.xlu1 %2071 }
 0x90e   : > { %v2125_v2 = vsel %vm1335_vm8, %v2102_v17, 0.0  ;;  %v2105_v63 = vmul.f32 %v2072_v18, %v1625_v48 }
 0x90f   : > { %v2124_v46 = vadd.f32 %v2123_v11, %v2122_v7  ;;  %v2067_v47 = vpop.permute.xlu0 %2066 }
 0x910   : > { %v2104_v59 = vmul.f32 %v2067_v47, %v1622_v20  ;;  %v2131_v50 = vsel %vm1335_vm8, %v2105_v63, 0.0 }
 0x911   : > { %v2126_v13 = vadd.f32 %v2125_v2, %v2124_v46  ;;  %v2082_v61 = vpop.permute.xlu1 %2081 }
 0x912   : > { %v2129_v37 = vsel %vm1335_vm8, %v2104_v59, 0.0  ;;  %v2107_v62 = vmul.f32 %v2082_v61, %v1633_v41 }
 0x913   : > { %v2128_v16 = vadd.f32 %v2127_v12, %v2126_v13  ;;  %v2077_v21 = vpop.permute.xlu0 %2076 }
 0x914   : > { %v2106_v35 = vmul.f32 %v2077_v21, %v1630_v60  ;;  %v2135_v4 = vsel %vm1335_vm8, %v2107_v62, 0.0 }
 0x915   : > { %v2130_v38 = vadd.f32 %v2129_v37, %v2128_v16  ;;  %v2092_v40 = vpop.permute.xlu1 %2091 }
 0x916   : > { %v2133_v19 = vsel %vm1335_vm8, %v2106_v35, 0.0  ;;  %v2109_v1 = vmul.f32 %v2092_v40, %v1641_v31 }
 0x917   : > { %v2132_v3 = vadd.f32 %v2131_v50, %v2130_v38  ;;  %v2087_v6 = vpop.permute.xlu0 %2086 }
 0x918   : > { %v2108_v22 = vmul.f32 %v2087_v6, %v1638_v14  ;;  %v2139_v45 = vsel %vm1335_vm8, %v2109_v1, 0.0 }
 0x919   : > { %v2134_v5 = vadd.f32 %v2133_v19, %v2132_v3 }
 0x91a   : > { %v2137_v49 = vsel %vm1335_vm8, %v2108_v22, 0.0 }
 0x91b   : > { %v2136_v42 = vadd.f32 %v2135_v4, %v2134_v5  ;;  %v2007_v0 = vpop.permute.xlu0 %2006 }
 0x91c   : > { %v2012_v44 = vrot.slane %v2007_v0, %v1910_v39 }
 0x91d   : > { %v2138_v36 = vadd.f32 %v2137_v49, %v2136_v42 }
 0x91e   : > { %v2013_v7 = vmul.f32 %v2012_v44, %v2003_v8 }
 0x91f   : > { %v2140_v43 = vadd.f32 %v2139_v45, %v2138_v36 }
 0x921   : > { %v2141_v9 = vrot.slane %v2140_v43, 4 }
 0x923   : > { %v2142_v10 = vadd.f32 %v2141_v9, %v2140_v43 }
 0x925   : > { %v2143_v34 = vrot.slane %v2142_v10, 2 }
 0x927   : > { %v2144_v15 = vadd.f32 %v2143_v34, %v2142_v10 }
 0x929   : > { %v2145_v17 = vrot.slane %v2144_v15, 1 }
 0x92b   : > { %v2146_v18 = vadd.f32 %v2145_v17, %v2144_v15 }
 0x92d   : > { %v2147_v20 = vadd.f32 %v2146_v18, %v2013_v7 }
 0x92f   : > { %2149 = vst.msk [vmem:[#allocation9] sm:$0x1] %vm2148_vm11, %v2147_v20 }
 0x930 PF: > { %s5956_s27 = sld [smem:[#allocation57_spill]] }
 0x936   : > { %p2992_p4 = scmp.ne.s32.totalorder %s5956_s27, 1 }
 0x937   : > { %v2168_v11 = vld [vmem:[#allocation4] sm:$0xff] (!%p2992_p4)  ;;  %v2169_v33 = vld [vmem:[#allocation4 + $0x8] sm:$0xff] (!%p2992_p4)  ;;  %v2170_v46 = vld [vmem:[#allocation4 + $0x10] sm:$0xff] (!%p2992_p4)  ;;  %3260 = vmatprep.mubr.msk.f32.mxu0 (!%p2992_p4), %vm1335_vm8, %v5263_v27  ;;  %3272 = vmatprep.mubr.msk.f32.mxu1 (!%p2992_p4), %vm1335_vm8, %v5265_v28  ;;  %v4446_v48 = vmov (!%p2992_p4), 0  }
 0x938   : > { %2154 = sbr.rel (%p2992_p4) target bundleno = 2774 (0xad6), region = 168  ;;  %v3307_v32 = vpack.c.bf16 (!%p2992_p4), %v2169_v33, %v2168_v11  ;;  %v2171_v39 = vld [vmem:[#allocation4 + $0x18] sm:$0xff] (!%p2992_p4)  ;;  %3670 = vset.pattern.permute.xlu0 (!%p2992_p4), %v4446_v48  ;;  %v2156_v2 = vld [vmem:[#allocation8] sm:$0x1] (!%p2992_p4)  ;;  %3671 = vset.pattern.permute.xlu1 (!%p2992_p4), %v4446_v48  ;;  %v5615_v59 = vld [vmem:[#allocation6] ss:$0 sm:$0xff] (!%p2992_p4) }
 0x939   : > { %v3311_v47 = vpack.c.bf16 (!%p2992_p4), %v2171_v39, %v2170_v46  ;;  %2159 = vperm.xlu0 (!%p2992_p4), %3670, %v2156_v2  }
 0x93a   : > { %3308 = vmatprep.subr.bf16.mxu0 (!%p2992_p4), %v3307_v32  ;;  %3319 = vmatprep.subr.bf16.mxu1 (!%p2992_p4), %v3307_v32 }
 0x93b   : > { %3310 = vmatpush3.bf16.msra.mxu0 (!%p2992_p4), %v3307_v32  ;;  %3321 = vmatpush3.bf16.msra.mxu1 (!%p2992_p4), %v3307_v32 }
 0x93c   : > { %3312 = vmatprep.subr.bf16.mxu0 (!%p2992_p4), %v3311_v47  ;;  %3320 = vmatprep.subr.bf16.mxu1 (!%p2992_p4), %v3311_v47 }
 0x93f   : > { %3314 = vmatpush3.bf16.msra.mxu0 %v3311_v47  ;;  %3322 = vmatpush3.bf16.msra.mxu1 %v3311_v47 }
 0x942   : > { %3261 = vmatmul.mubr.msk.f32.vlgmr.msra.gmra.mrb[0].mxu0 %vm1335_vm8, %v5267_v29  ;;  %3273 = vmatmul.mubr.msk.f32.vlgmr.msra.gmra.mrb[0].mxu1 %vm1335_vm8, %v5269_v30 }
 0x943   : > { %3263 = vmatprep.mubr.msk.f32.mxu0 %vm1335_vm8, %v5255_v23  ;;  %3275 = vmatprep.mubr.msk.f32.mxu1 %vm1335_vm8, %v5257_v24 }
 0x946   : > { %3264 = vmatmul.mubr.msk.f32.gmra.mrb[2].mxu0 %vm1335_vm8, %v5259_v25  ;;  %3276 = vmatmul.mubr.msk.f32.gmra.mrb[2].mxu1 %vm1335_vm8, %v5261_v26 }
 0x947   : > { %3266 = vmatprep.mubr.msk.f32.mxu0 %vm1335_vm8, %v5287_v55  ;;  %3278 = vmatprep.mubr.msk.f32.mxu1 %vm1335_vm8, %v5289_v56 }
 0x94a   : > { %3267 = vmatmul.mubr.msk.f32.gmra.mrb[4].mxu0 %vm1335_vm8, %v5291_v57  ;;  %3279 = vmatmul.mubr.msk.f32.gmra.mrb[4].mxu1 %vm1335_vm8, %v5293_v58 }
 0x94b   : > { %3269 = vmatprep.mubr.msk.f32.mxu0 %vm1335_vm8, %v5279_v51  ;;  %3281 = vmatprep.mubr.msk.f32.mxu1 %vm1335_vm8, %v5281_v52 }
 0x94e   : > { %3270 = vmatmul.mubr.msk.f32.gmra.mrb[6].mxu0 %vm1335_vm8, %v5283_v53  ;;  %3282 = vmatmul.mubr.msk.f32.gmra.mrb[6].mxu1 %vm1335_vm8, %v5285_v54 }
 0xa15   : > { %v3262_v60 = vpop.f32.mrb[0].mxu0  ;;  %v3274_v13 = vpop.f32.mrb[0].mxu1 }
 0xa16   : > { %v2299_v61 = vadd.f32 %v3262_v60, %v5615_v59  ;;  %v2339_v12 = vadd.f32 %v3274_v13, %v5615_v59  ;;  %v2293_v63 = vpop.f32.mrb[1].mxu0  ;;  %v2333_v41 = vpop.f32.mrb[1].mxu1 }
 0xa17   : > { %v2294_v16 = vadd.f32 %v5615_v59, %v2293_v63  ;;  %v2334_v21 = vadd.f32 %v5615_v59, %v2333_v41 }
 0xa18   : > { %v3011_v37 = vmul.f32 -0.17677669, %v2299_v61  ;;  %v3019_v35 = vmul.f32 -0.17677669, %v2339_v12 }
 0xa19   : > { %v3010_v38 = vmul.f32 -0.17677669, %v2294_v16  ;;  %v3018_v14 = vmul.f32 -0.17677669, %v2334_v21  ;;  %v3265_v50 = vpop.f32.mrb[2].mxu0  ;;  %v3277_v62 = vpop.f32.mrb[2].mxu1 }
 0xa1a   : > { %v2406_v3 = vmul.f32 1.442695, %v3011_v37  ;;  %v2422_v40 = vmul.f32 1.442695, %v3019_v35  ;;  %v2309_v6 = vadd.f32 %v3265_v50, %v5615_v59  ;;  %v2303_v31 = vpop.f32.mrb[3].mxu0  ;;  %v2349_v19 = vadd.f32 %v3277_v62, %v5615_v59  ;;  %v2343_v22 = vpop.f32.mrb[3].mxu1 }
 0xa1b   : > { %v2404_v5 = vmul.f32 1.442695, %v3010_v38  ;;  %v2420_v4 = vmul.f32 1.442695, %v3018_v14  ;;  %v2304_v1 = vadd.f32 %v5615_v59, %v2303_v31  ;;  %v2344_v42 = vadd.f32 %v5615_v59, %v2343_v22 }
 0xa1c   : > { %3672 = vpow2.f32 %v2406_v3  ;;  %v3013_v49 = vmul.f32 -0.17677669, %v2309_v6  ;;  %v3021_v36 = vmul.f32 -0.17677669, %v2349_v19 }
 0xa1d   : > { %3674 = vpow2.f32 %v2422_v40  ;;  %v3012_v45 = vmul.f32 -0.17677669, %v2304_v1  ;;  %v3020_v43 = vmul.f32 -0.17677669, %v2344_v42  ;;  %v3268_v9 = vpop.f32.mrb[4].mxu0  ;;  %v3280_v10 = vpop.f32.mrb[4].mxu1 }
 0xa1e   : > { %3676 = vpow2.f32 %v2404_v5  ;;  %v2410_v0 = vmul.f32 1.442695, %v3013_v49  ;;  %v2426_v34 = vmul.f32 1.442695, %v3021_v36  ;;  %v2319_v15 = vadd.f32 %v3268_v9, %v5615_v59  ;;  %v2313_v44 = vpop.f32.mrb[5].mxu0  ;;  %v2353_v8 = vpop.f32.mrb[5].mxu1 }
 0xa1f   : > { %3678 = vpow2.f32 %v2420_v4  ;;  %v2408_v17 = vmul.f32 1.442695, %v3012_v45  ;;  %v2424_v7 = vmul.f32 1.442695, %v3020_v43  ;;  %v2314_v18 = vadd.f32 %v5615_v59, %v2313_v44 }
 0xa20   : > { %3680 = vpow2.f32 %v2410_v0  ;;  %v3015_v20 = vmul.f32 -0.17677669, %v2319_v15  ;;  %v2359_v11 = vadd.f32 %v3280_v10, %v5615_v59  ;;  %v2354_v33 = vadd.f32 %v5615_v59, %v2353_v8 }
 0xa21   : > { %3682 = vpow2.f32 %v2408_v17  ;;  %v3014_v46 = vmul.f32 -0.17677669, %v2314_v18  ;;  %v3271_v32 = vpop.f32.mrb[6].mxu0  ;;  %v3283_v39 = vpop.f32.mrb[6].mxu1 }
 0xa22   : > { %3684 = vpow2.f32 %v2426_v34  ;;  %v2414_v47 = vmul.f32 1.442695, %v3015_v20  ;;  %v3022_v48 = vmul.f32 -0.17677669, %v2354_v33  ;;  %v3023_v60 = vmul.f32 -0.17677669, %v2359_v11 }
 0xa23   : > { %3686 = vpow2.f32 %v2424_v7  ;;  %v2412_v2 = vmul.f32 1.442695, %v3014_v46  ;;  %v2323_v13 = vpop.f32.mrb[7].mxu0  ;;  %v2363_v61 = vpop.f32.mrb[7].mxu1  ;;  %v2329_v14 = vadd.f32 %v3271_v32, %v5615_v59  ;;  %v2369_v31 = vadd.f32 %v3283_v39, %v5615_v59 }
 0xa24   : > { %3688 = vpow2.f32 %v2414_v47  ;;  %v2428_v12 = vmul.f32 1.442695, %v3022_v48  ;;  %v2430_v21 = vmul.f32 1.442695, %v3023_v60  ;;  %v2324_v40 = vadd.f32 %v5615_v59, %v2323_v13 }
 0xa25   : > { %3690 = vpow2.f32 %v2412_v2  ;;  %v2364_v4 = vadd.f32 %v5615_v59, %v2363_v61  ;;  %v3017_v49 = vmul.f32 -0.17677669, %v2329_v14  ;;  %v3025_v0 = vmul.f32 -0.17677669, %v2369_v31 }
 0xa26   : > { %v3673_v63 = vpop.eup %3672  ;;  %3692 = vpow2.f32 %v2428_v12  ;;  %v3016_v43 = vmul.f32 -0.17677669, %v2324_v40  ;;  %v2162_v31 = vlaneseq }
 0xa27   : > { %v3675_v41 = vpop.eup %3674  ;;  %v2437_v16 = vadd.f32 1.0, %v3673_v63  ;;  %v3024_v15 = vmul.f32 -0.17677669, %v2364_v4  ;;  %v2418_v44 = vmul.f32 1.442695, %v3017_v49 }
 0xa28   : > { %v3677_v37 = vpop.eup %3676  ;;  %v2445_v35 = vadd.f32 1.0, %v3675_v41  ;;  %v2416_v59 = vmul.f32 1.442695, %v3016_v43  ;;  %v2434_v7 = vmul.f32 1.442695, %v3025_v0 }
 0xa29   : > { %v3679_v38 = vpop.eup %3678  ;;  %3694 = vrcp.f32 %v2437_v16  ;;  %v2436_v62 = vadd.f32 1.0, %v3677_v37  ;;  %v2432_v20 = vmul.f32 1.442695, %v3024_v15 }
 0xa2a   : > { %v3681_v50 = vpop.eup %3680  ;;  %3696 = vrcp.f32 %v2445_v35  ;;  %v2444_v3 = vadd.f32 1.0, %v3679_v38 }
 0xa2b   : > { %v3683_v6 = vpop.eup %3682  ;;  %3698 = vpow2.f32 %v2430_v21  ;;  %v2439_v22 = vadd.f32 1.0, %v3681_v50 }
 0xa2c   : > { %v3685_v19 = vpop.eup %3684  ;;  %v2438_v5 = vadd.f32 1.0, %v3683_v6  ;;  %3700 = vrcp.f32 %v2444_v3 }
 0xa2d   : > { %v3687_v1 = vpop.eup %3686  ;;  %v2447_v42 = vadd.f32 1.0, %v3685_v19  ;;  %3702 = vrcp.f32 %v2436_v62  ;;  %v2163_v19 = vshrl.u32 %v2162_v31, 7 }
 0xa2e   : > { %v3689_v36 = vpop.eup %3688  ;;  %v2446_v45 = vadd.f32 1.0, %v3687_v1  ;;  %3704 = vrcp.f32 %v2438_v5  ;;  %v2160_v5 = vpop.permute.xlu0 %2159 }
 0xa2f   : > { %v3691_v9 = vpop.eup %3690  ;;  %v2441_v10 = vadd.f32 1.0, %v3689_v36  ;;  %3706 = vrcp.f32 %v2439_v22  ;;  %v2164_v22 = vsub.s32 0, %v2163_v19 }
 0xa30   : > { %v2440_v34 = vadd.f32 1.0, %v3691_v9  ;;  %3708 = vrcp.f32 %v2447_v42  ;;  %v3693_v8 = vpop.eup %3692  ;;  %v2155_v42 = vld [vmem:[#allocation9] sm:$0x1] }
 0xa31   : > { %3710 = vrcp.f32 %v2446_v45  ;;  %v2448_v46 = vadd.f32 1.0, %v3693_v8  ;;  %v2165_v4 = vrot.slane %v2160_v5, %v2164_v22 }
 0xa32   : > { %3712 = vrcp.f32 %v2441_v10 }
 0xa33   : > { %v3695_v17 = vpop.eup %3694  ;;  %3714 = vrcp.f32 %v2440_v34 }
 0xa34   : > { %v3697_v18 = vpop.eup %3696  ;;  %2491 = vperm.xlu1 %3671, %v3695_v17   ;;  %3716 = vpow2.f32 %v2418_v44 }
 0xa35   : > { %v3699_v11 = vpop.eup %3698  ;;  %2531 = vperm.xlu0 %3670, %v3697_v18   ;;  %3718 = vpow2.f32 %v2416_v59 }
 0xa36   : > { %v3701_v33 = vpop.eup %3700  ;;  %3720 = vpow2.f32 %v2434_v7  ;;  %v2449_v39 = vadd.f32 1.0, %v3699_v11 }
 0xa37   : > { %v3703_v32 = vpop.eup %3702  ;;  %3722 = vpow2.f32 %v2432_v20 }
 0xa38   : > { %2526 = vperm.xlu1 %3671, %v3701_v33   ;;  %v3705_v47 = vpop.eup %3704  ;;  %3724 = vrcp.f32 %v2448_v46 }
 0xa39   : > { %2486 = vperm.xlu0 %3670, %v3703_v32   ;;  %v3707_v48 = vpop.eup %3706  ;;  %3726 = vrcp.f32 %v2449_v39 }
 0xa3a   : > { %v3709_v2 = vpop.eup %3708 }
 0xa3b   : > { %v3711_v60 = vpop.eup %3710 }
 0xa3c   : > { %2496 = vperm.xlu1 %3671, %v3705_v47   ;;  %v3713_v13 = vpop.eup %3712 }
 0xa3d   : > { %2501 = vperm.xlu0 %3670, %v3707_v48   ;;  %v3715_v61 = vpop.eup %3714 }
 0xa3e   : > { %v3717_v12 = vpop.eup %3716 }
 0xa3f   : > { %v3719_v63 = vpop.eup %3718  ;;  %v2443_v41 = vadd.f32 1.0, %v3717_v12 }
 0xa40   : > { %2536 = vperm.xlu1 %3671, %v3711_v60   ;;  %v3721_v16 = vpop.eup %3720  ;;  %v2442_v21 = vadd.f32 1.0, %v3719_v63 }
 0xa41   : > { %2541 = vperm.xlu0 %3670, %v3709_v2   ;;  %v3723_v37 = vpop.eup %3722  ;;  %3728 = vrcp.f32 %v2443_v41  ;;  %v2451_v35 = vadd.f32 1.0, %v3721_v16 }
 0xa42   : > { %3730 = vrcp.f32 %v2442_v21  ;;  %v2450_v38 = vadd.f32 1.0, %v3723_v37  ;;  %v3725_v14 = vpop.eup %3724 }
 0xa43   : > { %3732 = vrcp.f32 %v2451_v35  ;;  %v3727_v50 = vpop.eup %3726 }
 0xa44   : > { %2506 = vperm.xlu1 %3671, %v3715_v61   ;;  %3734 = vrcp.f32 %v2450_v38 }
 0xa45   : > { %2511 = vperm.xlu0 %3670, %v3713_v13   ;;  %3736 = vrcp.f32 %v2165_v4 }
 0xa48   : > { %2546 = vperm.xlu1 %3671, %v3725_v14  }
 0xa49   : > { %2551 = vperm.xlu0 %3670, %v3727_v50  }
 0xa4b   : > { %v3729_v62 = vpop.eup %3728 }
 0xa4c   : > { %v3731_v3 = vpop.eup %3730 }
 0xa4d   : > { %2521 = vperm.xlu0 %3670, %v3729_v62   ;;  %v3733_v40 = vpop.eup %3732  ;;  %2516 = vperm.xlu1 %3671, %v3731_v3  }
 0xa4e   : > { %v3735_v6 = vpop.eup %3734 }
 0xa4f   : > { %v3737_v1 = vpop.eup %3736 }
 0xa50   : > { %v2167_v49 = vmul.f32 %v3737_v1, %v2155_v42 }
 0xa51   : > { %2561 = vperm.xlu0 %3670, %v3733_v40   ;;  %2556 = vperm.xlu1 %3671, %v3735_v6  }
 0xa52   : > { %v2568_v36 = vrot.slane %v2167_v49, %v2164_v22 }
 0xab3   : > { %v2492_v45 = vpop.permute.xlu1 %2491 }
 0xab4   : > { %v2571_v43 = vmul.f32 %v2568_v36, %v2492_v45  ;;  %v2532_v9 = vpop.permute.xlu0 %2531 }
 0xab5   : > { %v2579_v10 = vmul.f32 %v2568_v36, %v2532_v9 }
 0xab6   : > { %v2587_v0 = vadd.f32 %v2571_v43, %v5267_v29 }
 0xab7   : > { %v2595_v34 = vadd.f32 %v2579_v10, %v5269_v30  ;;  %v2527_v15 = vpop.permute.xlu1 %2526 }
 0xab8   : > { %2603 = vst.msk [vmem:[%s5197_s28 + $0x8] sm:$0xff] %vm1335_vm8, %v2587_v0  ;;  %v2578_v44 = vmul.f32 %v2568_v36, %v2527_v15  ;;  %v2487_v8 = vpop.permute.xlu0 %2486 }
 0xab9   : > { %2611 = vst.msk [vmem:[%s5197_s28 + $0x48] sm:$0xff] %vm1335_vm8, %v2595_v34  ;;  %v2570_v59 = vmul.f32 %v2568_v36, %v2487_v8 }
 0xaba   : > { %v2594_v17 = vadd.f32 %v2578_v44, %v5265_v28 }
 0xabb   : > { %v2586_v7 = vadd.f32 %v2570_v59, %v5263_v27  ;;  %v2497_v18 = vpop.permute.xlu1 %2496 }
 0xabc   : > { %2610 = vst.msk [vmem:[%s5197_s28 + $0x40] sm:$0xff] %vm1335_vm8, %v2594_v17  ;;  %v2572_v29 = vmul.f32 %v2568_v36, %v2497_v18  ;;  %v2502_v30 = vpop.permute.xlu0 %2501 }
 0xabd   : > { %2602 = vst.msk [vmem:[%s5197_s28] sm:$0xff] %vm1335_vm8, %v2586_v7  ;;  %v2573_v20 = vmul.f32 %v2568_v36, %v2502_v30 }
 0xabe   : > { %v2588_v11 = vadd.f32 %v2572_v29, %v5255_v23 }
 0xabf   : > { %v2589_v33 = vadd.f32 %v2573_v20, %v5259_v25  ;;  %v2537_v46 = vpop.permute.xlu1 %2536 }
 0xac0   : > { %2604 = vst.msk [vmem:[%s5197_s28 + $0x10] sm:$0xff] %vm1335_vm8, %v2588_v11  ;;  %v2580_v28 = vmul.f32 %v2568_v36, %v2537_v46  ;;  %v2542_v27 = vpop.permute.xlu0 %2541 }
 0xac1   : > { %2605 = vst.msk [vmem:[%s5197_s28 + $0x18] sm:$0xff] %vm1335_vm8, %v2589_v33  ;;  %v2581_v32 = vmul.f32 %v2568_v36, %v2542_v27 }
 0xac2   : > { %v2596_v39 = vadd.f32 %v2580_v28, %v5257_v24 }
 0xac3   : > { %v2597_v47 = vadd.f32 %v2581_v32, %v5261_v26  ;;  %v2507_v48 = vpop.permute.xlu1 %2506 }
 0xac4   : > { %2612 = vst.msk [vmem:[%s5197_s28 + $0x50] sm:$0xff] %vm1335_vm8, %v2596_v39  ;;  %v2574_v23 = vmul.f32 %v2568_v36, %v2507_v48  ;;  %v2512_v25 = vpop.permute.xlu0 %2511 }
 0xac5   : > { %2613 = vst.msk [vmem:[%s5197_s28 + $0x58] sm:$0xff] %vm1335_vm8, %v2597_v47  ;;  %v2575_v2 = vmul.f32 %v2568_v36, %v2512_v25 }
 0xac6   : > { %v2590_v60 = vadd.f32 %v2574_v23, %v5287_v55 }
 0xac7   : > { %v2591_v13 = vadd.f32 %v2575_v2, %v5291_v57  ;;  %v2547_v61 = vpop.permute.xlu1 %2546 }
 0xac8   : > { %2606 = vst.msk [vmem:[%s5197_s28 + $0x20] sm:$0xff] %vm1335_vm8, %v2590_v60  ;;  %v2582_v24 = vmul.f32 %v2568_v36, %v2547_v61  ;;  %v2552_v26 = vpop.permute.xlu0 %2551 }
 0xac9   : > { %2607 = vst.msk [vmem:[%s5197_s28 + $0x28] sm:$0xff] %vm1335_vm8, %v2591_v13  ;;  %v2583_v12 = vmul.f32 %v2568_v36, %v2552_v26 }
 0xaca   : > { %v2598_v63 = vadd.f32 %v2582_v24, %v5289_v56 }
 0xacb   : > { %v2599_v41 = vadd.f32 %v2583_v12, %v5293_v58 }
 0xacc   : > { %2614 = vst.msk [vmem:[%s5197_s28 + $0x60] sm:$0xff] %vm1335_vm8, %v2598_v63  ;;  %v2522_v55 = vpop.permute.xlu0 %2521  ;;  %v2517_v57 = vpop.permute.xlu1 %2516 }
 0xacd   : > { %2615 = vst.msk [vmem:[%s5197_s28 + $0x68] sm:$0xff] %vm1335_vm8, %v2599_v41  ;;  %v2577_v16 = vmul.f32 %v2568_v36, %v2522_v55  ;;  %v2576_v21 = vmul.f32 %v2568_v36, %v2517_v57 }
 0xacf   : > { %v2593_v37 = vadd.f32 %v2577_v16, %v5283_v53  ;;  %v2592_v35 = vadd.f32 %v2576_v21, %v5279_v51 }
 0xad0   : > { %v2562_v38 = vpop.permute.xlu0 %2561  ;;  %v2557_v56 = vpop.permute.xlu1 %2556 }
 0xad1   : > { %2609 = vst.msk [vmem:[%s5197_s28 + $0x38] sm:$0xff] %vm1335_vm8, %v2593_v37  ;;  %v2585_v14 = vmul.f32 %v2568_v36, %v2562_v38  ;;  %2608 = vst.msk [vmem:[%s5197_s28 + $0x30] sm:$0xff] %vm1335_vm8, %v2592_v35  ;;  %v2584_v58 = vmul.f32 %v2568_v36, %v2557_v56 }
 0xad3   : > { %v2601_v50 = vadd.f32 %v2585_v14, %v5285_v54  ;;  %v2600_v62 = vadd.f32 %v2584_v58, %v5281_v52 }
 0xad5   : > { %2617 = vst.msk [vmem:[%s5197_s28 + $0x78] sm:$0xff] %vm1335_vm8, %v2601_v50  ;;  %2616 = vst.msk [vmem:[%s5197_s28 + $0x70] sm:$0xff] %vm1335_vm8, %v2600_v62 }
 0xad6 PF: > { %s5957_s25 = sld [smem:[#allocation57_spill]]  ;;  %s5958_s11 = sld [smem:[#allocation56_spill]] }
 0xad7   : > { %s5959_s26 = sld [smem:[#allocation58_spill]]  ;;  %s2635_s6 = sshll.u32 %s5197_s28, 4  ;;  %s5685_s6 = int_to_ptr.vmem [resolvable:$true] %s2635_s6 }
 0xad8   : > { %s5961_s20 = sld [smem:[#allocation85_spill]]  ;;  %s5694_s19 = scalar_lea.sflag [#allocation12], %s848_s29 }
 0xad9   : > { %s4220_s9 = scalar_lea.vmem %s5685_s6, 2048  ;;  %p5963_p2 = scmp.ne.s32.totalorder %s5905_s1, 0 }
 0xada   : > { %p4221_p0 = scmp.ne.s32.totalorder %s5685_s6, %s4220_s9  ;;  %s4447_s28 = smov [#allocation37]  }
 0xadb   : > { %s4224_s2 = sshll.u32 %s4447_s28, 4  ;;  %s4225_s2 = int_to_ptr.vmem [resolvable:$false] %s4224_s2 }
 0xadc   : > { %s2626_s3 = smul.u32 %s5958_s11, %s5957_s25  ;;  %p4222_p12 = pnand %p4221_p0, %p5963_p2 }
 0xadd   : > { %s3028_s16 = sshll.u32 %s5959_s26, 5  ;;  %s4226_s27 = scalar_lea.vmem %s4225_s2, 4096 }
 0xade   : > { %s3027_s5 = sshll.u32 %s2626_s3, 4  ;;  %s5962_s7 = smov %s5961_s20 }
 0xadf   : > { %s2632_s8 = sadd.s32 %s3028_s16, %s3027_s5  ;;  %p4223_p11 = pneg %p4222_p12 }
 0xae0   : > { %s3029_s18 = sshll.u32 %s2632_s8, 7  ;;  %p4227_p6 = scmp.lt.s32.totalorder %s5685_s6, %s4225_s2 }
 0xae1   : > { %s5690_s24 = scalar_lea.hbm %s5961_s20, %s3029_s18  ;;  %p4228_p10 = scmp.lt.s32.totalorder %s4226_s27, %s4220_s9 }
 0xae3   : > { %p4229_p8 = por %p4228_p10, %p4227_p6 }
 0xae5   : > { %p4230_p13 = pnand %p4229_p8, %p4223_p11 }
 0xae7   : > { %4233 = shalt.err (!%p4230_p13)
}
 0xae8   : > { %s4234_s29 = scalar_lea.hbm %s5690_s24, 2048  ;;  %s4238_s26 = scalar_lea.hbm %s5962_s7, 8192 }
 0xae9   : > { %p4235_p1 = scmp.ne.s32.totalorder %s5690_s24, %s4234_s29  ;;  %p4239_p7 = scmp.lt.u32.totalorder %s5690_s24, %s5962_s7 }
 0xaea   : > { %p4240_p5 = scmp.lt.u32.totalorder %s4238_s26, %s4234_s29  ;;  %p4242_p0 = scmp.lt.u32.totalorder %s4234_s29, %s5690_s24 }
 0xaeb   : > { %p4236_p9 = pnand %p4235_p1, %p5963_p2 }
 0xaec   : > { %p4241_p4 = por %p4240_p5, %p4239_p7 }
 0xaed   : > { %p4237_p3 = pneg %p4236_p9 }
 0xaee   : > { %p4243_p12 = por %p4242_p0, %p4241_p4 }
 0xaf0   : > { %p4244_p11 = pnand %p4243_p12, %p4237_p3 }
 0xaf2   : > { %4247 = shalt.err (!%p4244_p11)
}
 0xaf3   : > { %s4448_s16 = smov 128   ;;  %s4449_s5 = smov 8  }
 0xaf4   : > { %3385 = dma.vmem_to_hbm [thread:$0]  (%p5963_p2), %s5685_s6, 2048, %s5690_s24, %s5694_s19, %s4448_s16, %s4448_s16, %s4449_s5  }
 0xaf5 PF: > { %s5964_s8 = sld [smem:[#allocation49_spill]]  ;;  %s5965_s18 = sld [smem:[#allocation67_spill]] }
 0xaf6   : > { %p3473_p6 = scmp.ge.s32.totalorder %s4418_s17, 2 }
 0xafb   : > { %s2650_s22 = sand.u32 1, %s5964_s8   ;;  %p5966_p10 = scmp.ne.s32.totalorder %s5965_s18, 0 }
 0xafc   : > { %s2651_s15 = scalar_lea.sflag [#allocation12], %s2650_s22 }
 0xafd   : > { %p3441_p8 = pnand %p3473_p6, %p5966_p10 }
 0xaff   : > { %4353 = dma.done.wait (!%p3441_p8), %s2651_s15, 2048  }
 0xb00   : > { %4355 = vsyncadd (!%p3441_p8), %s2651_s15, 4294965248  ;;  %s43_s17 = sadd.s32 1, %s4418_s17   ;;  %s5968_s24 = sld [smem:[#allocation50_spill]] }
 0xb01   : > { %p5723_p13 = scmp.ge.s32.totalorder %s43_s17, 10   ;;  %s5969_s25 = sld [smem:[#allocation51_spill]] }
 0xb02   : > { %s5970_s26 = sld [smem:[#allocation66_spill]]  ;;  %s5971_s27 = sld [smem:[#allocation53_spill]] }
 0xb03   : > { %s5972_s28 = sld [smem:[#allocation54_spill]]  ;;  %s5973_s29 = sld [smem:[#allocation65_spill]] }
 0xb04   : > { %s5974_s1 = sld [smem:[#allocation55_spill]]  ;;  %s5975_s18 = sld [smem:[#allocation64_spill]] }
 0xb05   : > { %s5976_s6 = sld [smem:[#allocation59_spill]]  ;;  %s5977_s9 = sld [smem:[#allocation61_spill]] }
 0xb06   : > { %s5978_s22 = sld [smem:[#allocation62_spill]]  ;;  %s5979_s2 = sld [smem:[#allocation63_spill]] }
 0xb07   : > { %s5981_s0 = smov %s4386_s30  ;;  %s5983_s19 = smov %s4406_s21 }
 0xb08   : > { %s5985_s20 = smov %s4414_s23  ;;  %42 = sbr.rel (!%p5723_p13) target bundleno = 39 (0x27), region = 225 }
 0xb0a   : > { %s5982_s30 = smov %s5974_s1 }
 0xb0b   : > { %s5984_s1 = smov %s5976_s6  ;;  %s5986_s21 = smov %s5977_s9 }
 0xb0c   : > { %s5987_s23 = smov %s5979_s2 }
 0xb0f   :  { %2656 = vsyncpa [#allocation11], 1 }
 0xb10   :  { %2658 = vsyncpa [#allocation11 + $0x1], 1 }
 0xb11   :  { %2659 = vsyncpa [#allocation14], 1 }
 0xb12   :  { %2661 = vsyncpa [#allocation14 + $0x1], 1 }
 0xb13   :  { %2662 = vsyncpa [#allocation17], 1 }
 0xb14   :  { %2663 = vsyncpa [#allocation20], 1 }
 0xb15   :  { %2664 = vsyncpa [#allocation23], 1 }
 0xb16   :  { %2665 = vsyncpa [#allocation26], 1 }
 0xb17   :  { %2666 = vsyncpa [#allocation29], 1 }
 0xb18   :  { %2667 = vsyncpa [#allocation32], 1 }
 0xb19   :  { %2668 = vsyncpa [#allocation35], 1 }
 0xb1a   :  { %2669 = vsyncpa [#allocation12], 1 }
 0xb1b   :  { %2671 = vsyncpa [#allocation12 + $0x1], 1 }

</bundles_post_ra>
